<compile_context>
chip_gen: v6e
topology: v6e:2x2x1
jax: 0.10.0
libtpu: 0.0.40
codegen_flags: <defaults>
</compile_context>

<pallas_src>
import math
from functools import partial

import jax
import jax.numpy as jnp
from jax import lax
from jax.experimental import pallas as pl
from jax.experimental.pallas import tpu as pltpu

VMEM = pltpu.MemorySpace.VMEM
LANE = 128


# ---------------------------------------------------------------------------
# Helpers
# ---------------------------------------------------------------------------
def _round_up(x, m):
    return (x + m - 1) // m * m


def _pad2(a, rows, cols):
    r, c = a.shape
    if r == rows and c == cols:
        return a
    return jnp.pad(a, ((0, rows - r), (0, cols - c)))


def _hw_config():
    """Generation-aware tile sizes, scoped-VMEM limit and fused-path cap."""
    try:
        kind = jax.devices()[0].device_kind.lower()
    except Exception:
        kind = ""
    mib = 1 << 20
    if "v5" in kind or "v6" in kind:
        # 128 MiB physical VMEM; raise the scoped default, allow big fused graphs.
        return dict(tm=512, tk=2048, tk_full=2048, vmem=96 * mib, fused_cap=4096)
    # v7x (and unknown): 64 MiB physical per TC, 2 TCs -> fused forfeits one
    # core, so keep the fused cutover lower and tiles a bit smaller.
    return dict(tm=256, tk=2048, tk_full=2048, vmem=48 * mib, fused_cap=2560)


def _pick_tile(n_pad, max_tile):
    """Largest multiple of 128 that divides n_pad and is <= max_tile."""
    best = LANE
    t = LANE
    limit = min(max_tile, n_pad)
    while t <= limit:
        if n_pad % t == 0:
            best = t
        t += LANE
    return best


def _fused_fits(n_pad, fin_p, hid_p, nssf_p, ncls_p, vmem_bytes, cap_n):
    """Estimate whether the whole-graph fused kernel fits the scoped VMEM."""
    if n_pad > cap_n:
        return False
    est = (n_pad * n_pad * 2                         # adj (bf16)
           + n_pad * fin_p * 2                       # x (bf16)
           + 4 * n_pad * max(hid_p, nssf_p) * 4      # h / support temporaries
           + n_pad * nssf_p * 4                      # x3 output
           + 2 * n_pad * ncls_p * 4                  # out + loss outputs
           + (fin_p * hid_p + hid_p * hid_p + hid_p * nssf_p) * 2  # weights
           + nssf_p * ncls_p * 4)                    # ssf
    return est <= int(0.75 * vmem_bytes)


def _head_math(x, ssf, nclass, sn2=None, s_norm=None):
    """out = x @ ssf; spatial_loss = 0.5*(log_softmax(-cdist) + log_softmax(cos)).

    `ssf` is already thresholded and zero-padded to 128 lanes; padded class
    columns (>= nclass) are masked out of the softmax normalization.
    """
    g = jnp.dot(x, ssf, preferred_element_type=jnp.float32)        # [R, Cp]
    xn2 = jnp.sum(x * x, axis=1, keepdims=True)                    # [R, 1]
    if sn2 is None:
        sn2 = jnp.sum(ssf * ssf, axis=0, keepdims=True)            # [1, Cp]
    if s_norm is None:
        s_norm = jnp.sqrt(sn2)
    x_norm = jnp.sqrt(xn2)

    # spatial_dist = -cdist(x, ssf.T, p=2)
    d2 = jnp.maximum(xn2 + sn2 - 2.0 * g, 0.0)
    dist = -jnp.sqrt(d2)

    # torch CosineSimilarity clamps each norm to eps separately; exact divide.
    denom = jnp.maximum(x_norm, 1e-6) * jnp.maximum(s_norm, 1e-6)
    cos = g / denom

    cols = lax.broadcasted_iota(jnp.int32, g.shape, 1)
    neg = jnp.float32(-1e30)
    dist = jnp.where(cols < nclass, dist, neg)
    cos = jnp.where(cols < nclass, cos, neg)

    def log_softmax(z):
        m = jnp.max(z, axis=1, keepdims=True)
        zs = z - m
        return zs - jnp.log(jnp.sum(jnp.exp(zs), axis=1, keepdims=True))

    loss = 0.5 * (log_softmax(dist) + log_softmax(cos))
    return g, loss


# ---------------------------------------------------------------------------
# Kernel 1: support = x @ W + b   (row-tiled; bf16 inputs, bf16 output)
# ---------------------------------------------------------------------------
def _support_kernel(x_ref, w_ref, b_ref, s_ref):
    s = jnp.dot(x_ref[...].astype(jnp.bfloat16), w_ref[...],
                preferred_element_type=jnp.float32) + b_ref[...]
    s_ref[...] = s.astype(s_ref.dtype)


def _support(x, w, b, *, tm, vmem):
    n, fin = x.shape
    fout = w.shape[1]
    return pl.pallas_call(
        _support_kernel,
        out_shape=jax.ShapeDtypeStruct((n, fout), jnp.bfloat16),
        grid=(n // tm,),
        in_specs=[
            pl.BlockSpec((tm, fin), lambda i: (i, 0)),
            pl.BlockSpec((fin, fout), lambda i: (0, 0)),
            pl.BlockSpec((1, fout), lambda i: (0, 0)),
        ],
        out_specs=pl.BlockSpec((tm, fout), lambda i: (i, 0)),
        compiler_params=pltpu.CompilerParams(
            dimension_semantics=("parallel",), vmem_limit_bytes=vmem),
    )(x, w, b)


# ---------------------------------------------------------------------------
# Kernel 2: y = adj @ support (+ optional relu)
#   - single-shot when the whole reduction fits one block (no accumulator)
#   - otherwise a reduction grid; f32 outputs accumulate directly into y_ref,
#     bf16 outputs use an f32 VMEM accumulator.
# ---------------------------------------------------------------------------
def _spmm_single_kernel(adj_ref, sup_ref, y_ref, *, apply_relu):
    y = jnp.dot(adj_ref[...], sup_ref[...], preferred_element_type=jnp.float32)
    if apply_relu:
        y = jnp.maximum(y, 0.0)
    y_ref[...] = y.astype(y_ref.dtype)


def _spmm_reduce_f32_kernel(adj_ref, sup_ref, y_ref, *, apply_relu):
    k = pl.program_id(1)

    @pl.when(k == 0)
    def _():
        y_ref[...] = jnp.zeros_like(y_ref)

    y_ref[...] += jnp.dot(adj_ref[...], sup_ref[...],
                          preferred_element_type=jnp.float32)

    if apply_relu:
        @pl.when(k == pl.num_programs(1) - 1)
        def _():
            y_ref[...] = jnp.maximum(y_ref[...], 0.0)


def _spmm_reduce_acc_kernel(adj_ref, sup_ref, y_ref, acc_ref, *, apply_relu):
    k = pl.program_id(1)

    @pl.when(k == 0)
    def _():
        acc_ref[...] = jnp.zeros_like(acc_ref)

    acc_ref[...] += jnp.dot(adj_ref[...], sup_ref[...],
                            preferred_element_type=jnp.float32)

    @pl.when(k == pl.num_programs(1) - 1)
    def _():
        y = acc_ref[...]
        if apply_relu:
            y = jnp.maximum(y, 0.0)
        y_ref[...] = y.astype(y_ref.dtype)


def _spmm(adj_bf16, support_bf16, *, apply_relu, out_dtype, tm, tk, vmem):
    n = adj_bf16.shape[0]
    fout = support_bf16.shape[1]

    if tk >= n:
        # whole reduction in one block: no accumulator, no init/finalize.
        return pl.pallas_call(
            partial(_spmm_single_kernel, apply_relu=apply_relu),
            out_shape=jax.ShapeDtypeStruct((n, fout), out_dtype),
            grid=(n // tm,),
            in_specs=[pl.BlockSpec((tm, n), lambda i: (i, 0)),
                      pl.BlockSpec((n, fout), lambda i: (0, 0))],
            out_specs=pl.BlockSpec((tm, fout), lambda i: (i, 0)),
            compiler_params=pltpu.CompilerParams(
                dimension_semantics=("parallel",), vmem_limit_bytes=vmem),
        )(adj_bf16, support_bf16)

    # adj is the dominant HBM stream: triple-buffer it if supported.
    try:
        adj_spec = pl.BlockSpec((tm, tk), lambda i, k: (i, k),
                                pipeline_mode=pl.Buffered(3))
    except TypeError:
        adj_spec = pl.BlockSpec((tm, tk), lambda i, k: (i, k))

    common = dict(
        out_shape=jax.ShapeDtypeStruct((n, fout), out_dtype),
        grid=(n // tm, n // tk),
        in_specs=[adj_spec,
                  pl.BlockSpec((tk, fout), lambda i, k: (k, 0))],
        out_specs=pl.BlockSpec((tm, fout), lambda i, k: (i, 0)),
        compiler_params=pltpu.CompilerParams(
            dimension_semantics=("parallel", "arbitrary"),
            vmem_limit_bytes=vmem),
    )
    if out_dtype == jnp.float32:
        return pl.pallas_call(
            partial(_spmm_reduce_f32_kernel, apply_relu=apply_relu), **common,
        )(adj_bf16, support_bf16)
    return pl.pallas_call(
        partial(_spmm_reduce_acc_kernel, apply_relu=apply_relu),
        scratch_shapes=[pltpu.VMEM((tm, fout), jnp.float32)], **common,
    )(adj_bf16, support_bf16)


# ---------------------------------------------------------------------------
# Kernel 3: head — out = x@ssf, -cdist, cosine sim, 0.5*(logsm + logsm)
#   (row-tiled; ssf pre-thresholded, column norms precomputed and passed in)
# ---------------------------------------------------------------------------
def _head_kernel(x_ref, ssf_ref, stats_ref, out_ref, loss_ref, *, nclass):
    g, loss = _head_math(x_ref[...], ssf_ref[...], nclass,
                         sn2=stats_ref[0:1, :], s_norm=stats_ref[1:2, :])
    out_ref[...] = g
    loss_ref[...] = loss


def _head(x3, ssf_sparse, stats, *, nclass, tm, vmem):
    n, nssf_p = x3.shape
    ncls_p = ssf_sparse.shape[1]
    return pl.pallas_call(
        partial(_head_kernel, nclass=nclass),
        out_shape=(jax.ShapeDtypeStruct((n, ncls_p), jnp.float32),
                   jax.ShapeDtypeStruct((n, ncls_p), jnp.float32)),
        grid=(n // tm,),
        in_specs=[
            pl.BlockSpec((tm, nssf_p), lambda i: (i, 0)),
            pl.BlockSpec((nssf_p, ncls_p), lambda i: (0, 0)),
            pl.BlockSpec((2, ncls_p), lambda i: (0, 0)),
        ],
        out_specs=(pl.BlockSpec((tm, ncls_p), lambda i: (i, 0)),
                   pl.BlockSpec((tm, ncls_p), lambda i: (i, 0))),
        compiler_params=pltpu.CompilerParams(
            dimension_semantics=("parallel",), vmem_limit_bytes=vmem),
    )(x3, ssf_sparse, stats)


# ---------------------------------------------------------------------------
# Kernel 4: fully fused forward (adj read from HBM exactly once)
# ---------------------------------------------------------------------------
def _fused_kernel(x_ref, adj_ref, w1_ref, b1_ref, w2_ref, b2_ref,
                  w3_ref, b3_ref, ssf_ref,
                  out_ref, x3_ref, loss_ref, *, nclass):
    def layer(x, w_ref, b_ref, relu):
        s = jnp.dot(x.astype(jnp.bfloat16), w_ref[...],
                    preferred_element_type=jnp.float32) + b_ref[...]
        y = jnp.dot(adj_ref[...], s.astype(jnp.bfloat16),
                    preferred_element_type=jnp.float32)
        return jnp.maximum(y, 0.0) if relu else y

    h = layer(x_ref[...], w1_ref, b1_ref, True)
    h = layer(h, w2_ref, b2_ref, True)
    x3 = layer(h, w3_ref, b3_ref, False)
    x3_ref[...] = x3

    g, loss = _head_math(x3, ssf_ref[...], nclass)
    out_ref[...] = g
    loss_ref[...] = loss


def _fused_forward(x_p, adj_p, pp, ssf_sp_pad, *, nclass, vmem):
    n_pad = x_p.shape[0]
    nssf_p, ncls_p = ssf_sp_pad.shape
    return pl.pallas_call(
        partial(_fused_kernel, nclass=nclass),
        out_shape=(jax.ShapeDtypeStruct((n_pad, ncls_p), jnp.float32),
                   jax.ShapeDtypeStruct((n_pad, nssf_p), jnp.float32),
                   jax.ShapeDtypeStruct((n_pad, ncls_p), jnp.float32)),
        in_specs=[pl.BlockSpec(memory_space=VMEM)] * 9,
        out_specs=(pl.BlockSpec(memory_space=VMEM),) * 3,
        compiler_params=pltpu.CompilerParams(vmem_limit_bytes=vmem),
    )(x_p, adj_p, pp["w1"], pp["b1"], pp["w2"], pp["b2"],
      pp["w3"], pp["b3"], ssf_sp_pad)


# ---------------------------------------------------------------------------
# Parameters (mirrors the torch shapes: Linear(in,out) weights stored [in,out];
# uniform(-1/sqrt(in), 1/sqrt(in))).
# ---------------------------------------------------------------------------
def init_params(key, nfeat, nhid, nssf, nclass):
    ks = jax.random.split(key, 7)

    def lin(kw, kb, fin, fout):
        stdv = 1.0 / math.sqrt(fin)
        w = jax.random.uniform(kw, (fin, fout), jnp.float32, -stdv, stdv)
        b = jax.random.uniform(kb, (1, fout), jnp.float32, -stdv, stdv)
        return w, b

    w1, b1 = lin(ks[0], ks[1], nfeat, nhid)
    w2, b2 = lin(ks[2], ks[3], nhid, nhid)
    w3, b3 = lin(ks[4], ks[5], nhid, nssf)
    # torch leaves subspace_filter uninitialized; use a deterministic uniform.
    ssf = jax.random.uniform(ks[6], (nssf, nclass), jnp.float32, -1.0, 1.0)
    return dict(w1=w1, b1=b1, w2=w2, b2=b2, w3=w3, b3=b3, ssf=ssf)


# ---------------------------------------------------------------------------
# adj preparation (hoisted out of the forward path — do this once per graph)
# ---------------------------------------------------------------------------
def prepare_adj(adj):
    n = adj.shape[0]
    n_pad = _round_up(n, LANE)
    return _pad2(adj, n_pad, n_pad).astype(jnp.bfloat16)


# ---------------------------------------------------------------------------
# Full forward
# ---------------------------------------------------------------------------
def gcn_ssf_forward(params, x, adj, sp_rate, *, mode="auto", tiles=None):
    """Returns (out, ssf_sparse, x3, spatial_loss, sigma) like the torch module.

    `adj` may be the raw [N, N] f32 adjacency, or — preferably — the cached
    result of `prepare_adj(adj)` (padded, bf16) so the pad/cast HBM traffic is
    paid once per graph instead of once per call.
    mode: "auto" | "fused" | "tiled".  `tiles=(tm, tk)` overrides tile sizes.
    """
    n, nfeat = x.shape
    nhid = params["w1"].shape[1]
    nssf = params["w3"].shape[1]
    nclass = params["ssf"].shape[1]
    cfg = _hw_config()
    n_pad = _round_up(n, LANE)

    if adj.dtype == jnp.bfloat16 and adj.shape == (n_pad, n_pad):
        adj_p = adj                                   # already prepared
    else:
        adj_p = prepare_adj(adj)

    # --- threshold + column stats (tiny glue; plain JAX) ---------------------
    flat = jnp.abs(params["ssf"]).reshape(-1)
    sorted_w = jnp.sort(flat)
    # torch's round(numel*sp_rate) indexes out of bounds at sp_rate == 1.0;
    # clamped here (intentional semantic difference).
    filter_idx = min(round(flat.shape[0] * sp_rate), flat.shape[0] - 1)
    thr = sorted_w[filter_idx]
    ssf_sparse = jnp.where(jnp.abs(params["ssf"]) >= thr, params["ssf"], 0.0)

    # --- pad feature/class dims to 128 lanes (lane-dense MXU tiles / stores) -
    fin_p, hid_p, ssf_dim_p, cls_p = (_round_up(d, LANE)
                                      for d in (nfeat, nhid, nssf, nclass))
    # Padded rows of x produce support == bias only; this is harmless because
    # the corresponding adj columns are zero-padded.
    pp = dict(
        w1=_pad2(params["w1"], fin_p, hid_p).astype(jnp.bfloat16),
        b1=_pad2(params["b1"], 1, hid_p),
        w2=_pad2(params["w2"], hid_p, hid_p).astype(jnp.bfloat16),
        b2=_pad2(params["b2"], 1, hid_p),
        w3=_pad2(params["w3"], hid_p, ssf_dim_p).astype(jnp.bfloat16),
        b3=_pad2(params["b3"], 1, ssf_dim_p),
    )
    ssf_sp_pad = _pad2(ssf_sparse, ssf_dim_p, cls_p)
    x_p = _pad2(x, n_pad, fin_p).astype(jnp.bfloat16)

    if mode == "auto":
        mode = ("fused"
                if _fused_fits(n_pad, fin_p, hid_p, ssf_dim_p, cls_p,
                               cfg["vmem"], cfg["fused_cap"])
                else "tiled")

    if mode == "fused":
        out_p, x3_p, loss_p = _fused_forward(
            x_p, adj_p, pp, ssf_sp_pad, nclass=nclass, vmem=cfg["vmem"])
    else:
        if tiles is not None:
            tm, tk = tiles
        else:
            tm = _pick_tile(n_pad, cfg["tm"])
            tk = n_pad if n_pad <= cfg["tk_full"] else _pick_tile(n_pad, cfg["tk"])

        def layer(h, w, b, relu, out_dtype):
            sup = _support(h, w, b, tm=tm, vmem=cfg["vmem"])
            return _spmm(adj_p, sup, apply_relu=relu, out_dtype=out_dtype,
                         tm=tm, tk=tk, vmem=cfg["vmem"])

        h = layer(x_p, pp["w1"], pp["b1"], True, jnp.bfloat16)
        h = layer(h, pp["w2"], pp["b2"], True, jnp.bfloat16)
        x3_p = layer(h, pp["w3"], pp["b3"], False, jnp.float32)

        sn2 = jnp.sum(ssf_sp_pad * ssf_sp_pad, axis=0, keepdims=True)
        stats = jnp.concatenate([sn2, jnp.sqrt(sn2)], axis=0)   # (2, cls_p)
        out_p, loss_p = _head(x3_p, ssf_sp_pad, stats, nclass=nclass,
                              tm=tm, vmem=cfg["vmem"])

    out = out_p[:n, :nclass]
    x3 = x3_p[:n, :nssf]
    spatial_loss = loss_p[:n, :nclass]

    # TODO(synk): reference module reads `self.sigma` which is never defined in
    # __init__; exposed here as a deterministic scalar stand-in.
    sigma = jnp.float32(1.0)
    return out, ssf_sparse, x3, spatial_loss, sigma


if __name__ == "__main__":
    key = jax.random.PRNGKey(0)
    nfeat, nhid, nssf, nclass = 16, 32, 16, 8
    sp_rate = 0.5

    kx, kadj, kp, kx2, kadj2 = jax.random.split(key, 5)
    params = init_params(kp, nfeat, nhid, nssf, nclass)

    # --- small graph: fused single-kernel path vs tiled path -----------------
    n_small = 64
    x_s = jax.random.normal(kx, (n_small, nfeat), jnp.float32)
    adj_s_raw = jax.random.uniform(kadj, (n_small, n_small), jnp.float32) / n_small
    adj_s = prepare_adj(adj_s_raw)            # prepared once, reused below

    out_f, ssf_sp, x3_f, loss_f, sigma = gcn_ssf_forward(
        params, x_s, adj_s, sp_rate, mode="fused")
    out_t, _, x3_t, loss_t, _ = gcn_ssf_forward(
        params, x_s, adj_s, sp_rate, mode="tiled")
    jax.block_until_ready((out_f, ssf_sp, x3_f, loss_f, out_t, x3_t, loss_t))

    assert out_f.shape == (n_small, nclass)
    assert ssf_sp.shape == (nssf, nclass)
    assert x3_f.shape == (n_small, nssf)
    assert loss_f.shape == (n_small, nclass)
    assert bool(jnp.all(jnp.isfinite(loss_f)))
    assert bool(jnp.all(jnp.isfinite(loss_t)))
    assert bool(jnp.allclose(out_f, out_t, rtol=2e-2, atol=2e-2))
    assert bool(jnp.allclose(x3_f, x3_t, rtol=2e-2, atol=2e-2))

    # --- larger graph (non-multiple of 128): tiled path, single-shot K -------
    n_big = 520
    x_b = jax.random.normal(kx2, (n_big, nfeat), jnp.float32)
    adj_b = prepare_adj(
        jax.random.uniform(kadj2, (n_big, n_big), jnp.float32) / n_big)

    out_b, ssf_b, x3_b, loss_b, _ = gcn_ssf_forward(
        params, x_b, adj_b, sp_rate, mode="tiled")
    # same graph, forced small tiles -> exercises the reduction-grid kernels
    out_r, _, x3_r, loss_r, _ = gcn_ssf_forward(
        params, x_b, adj_b, sp_rate, mode="tiled", tiles=(128, 128))
    jax.block_until_ready((out_b, ssf_b, x3_b, loss_b, out_r, x3_r, loss_r))

    assert out_b.shape == (n_big, nclass)
    assert ssf_b.shape == (nssf, nclass)
    assert x3_b.shape == (n_big, nssf)
    assert loss_b.shape == (n_big, nclass)
    assert bool(jnp.all(jnp.isfinite(loss_b)))
    assert bool(jnp.all(jnp.isfinite(loss_r)))
    assert bool(jnp.allclose(out_b, out_r, rtol=2e-2, atol=2e-2))
    assert bool(jnp.allclose(x3_b, x3_r, rtol=2e-2, atol=2e-2))

    print("KERNEL_OK")
</pallas_src>

<mosaic_0001>
module attributes {stable_mosaic.version = 11 : i64} {
  func.func @_fused_kernel(%arg0: memref<128x128xbf16, #tpu.memory_space<vmem>>, %arg1: memref<128x128xbf16, #tpu.memory_space<vmem>>, %arg2: memref<128x128xbf16, #tpu.memory_space<vmem>>, %arg3: memref<1x128xf32, #tpu.memory_space<vmem>>, %arg4: memref<128x128xbf16, #tpu.memory_space<vmem>>, %arg5: memref<1x128xf32, #tpu.memory_space<vmem>>, %arg6: memref<128x128xbf16, #tpu.memory_space<vmem>>, %arg7: memref<1x128xf32, #tpu.memory_space<vmem>>, %arg8: memref<128x128xf32, #tpu.memory_space<vmem>>, %arg9: memref<128x128xf32, #tpu.memory_space<vmem>>, %arg10: memref<128x128xf32, #tpu.memory_space<vmem>>, %arg11: memref<128x128xf32, #tpu.memory_space<vmem>>) attributes {dimension_semantics = [], scalar_prefetch = 0 : i64, scratch_operands = 0 : i64, tpu.core_type = #tpu.core_type<tc>} {
    %c0 = arith.constant 0 : index
    %c0_0 = arith.constant 0 : index
    %0 = vector.load %arg0[%c0, %c0_0] : memref<128x128xbf16, #tpu.memory_space<vmem>>, vector<128x128xbf16>
    %c0_1 = arith.constant 0 : index
    %c0_2 = arith.constant 0 : index
    %1 = vector.load %arg2[%c0_1, %c0_2] : memref<128x128xbf16, #tpu.memory_space<vmem>>, vector<128x128xbf16>
    %cst = arith.constant dense<0.000000e+00> : vector<128x128xf32>
    %2 = tpu.matmul %0, %1, %cst {dimension_numbers = #tpu.dot_dimension_numbers<[1], [0], [0], [1], [0, 0, 1, 1], [], []>} : vector<128x128xbf16>, vector<128x128xbf16>, vector<128x128xf32> -> vector<128x128xf32>
    %c0_3 = arith.constant 0 : index
    %c0_4 = arith.constant 0 : index
    %3 = vector.load %arg3[%c0_3, %c0_4] : memref<1x128xf32, #tpu.memory_space<vmem>>, vector<1x128xf32>
    %4 = vector.broadcast %3 : vector<1x128xf32> to vector<128x128xf32>
    %5 = arith.addf %2, %4 : vector<128x128xf32>
    %c0_5 = arith.constant 0 : index
    %c0_6 = arith.constant 0 : index
    %6 = vector.load %arg1[%c0_5, %c0_6] : memref<128x128xbf16, #tpu.memory_space<vmem>>, vector<128x128xbf16>
    %7 = arith.truncf %5 : vector<128x128xf32> to vector<128x128xbf16>
    %cst_7 = arith.constant dense<0.000000e+00> : vector<128x128xf32>
    %8 = tpu.matmul %6, %7, %cst_7 {dimension_numbers = #tpu.dot_dimension_numbers<[1], [0], [0], [1], [0, 0, 1, 1], [], []>} : vector<128x128xbf16>, vector<128x128xbf16>, vector<128x128xf32> -> vector<128x128xf32>
    %cst_8 = arith.constant 0.000000e+00 : f32
    %9 = vector.broadcast %cst_8 : f32 to vector<128x128xf32>
    %10 = arith.maximumf %8, %9 : vector<128x128xf32>
    %11 = arith.truncf %10 : vector<128x128xf32> to vector<128x128xbf16>
    %c0_9 = arith.constant 0 : index
    %c0_10 = arith.constant 0 : index
    %12 = vector.load %arg4[%c0_9, %c0_10] : memref<128x128xbf16, #tpu.memory_space<vmem>>, vector<128x128xbf16>
    %cst_11 = arith.constant dense<0.000000e+00> : vector<128x128xf32>
    %13 = tpu.matmul %11, %12, %cst_11 {dimension_numbers = #tpu.dot_dimension_numbers<[1], [0], [0], [1], [0, 0, 1, 1], [], []>} : vector<128x128xbf16>, vector<128x128xbf16>, vector<128x128xf32> -> vector<128x128xf32>
    %c0_12 = arith.constant 0 : index
    %c0_13 = arith.constant 0 : index
    %14 = vector.load %arg5[%c0_12, %c0_13] : memref<1x128xf32, #tpu.memory_space<vmem>>, vector<1x128xf32>
    %15 = vector.broadcast %14 : vector<1x128xf32> to vector<128x128xf32>
    %16 = arith.addf %13, %15 : vector<128x128xf32>
    %c0_14 = arith.constant 0 : index
    %c0_15 = arith.constant 0 : index
    %17 = vector.load %arg1[%c0_14, %c0_15] : memref<128x128xbf16, #tpu.memory_space<vmem>>, vector<128x128xbf16>
    %18 = arith.truncf %16 : vector<128x128xf32> to vector<128x128xbf16>
    %cst_16 = arith.constant dense<0.000000e+00> : vector<128x128xf32>
    %19 = tpu.matmul %17, %18, %cst_16 {dimension_numbers = #tpu.dot_dimension_numbers<[1], [0], [0], [1], [0, 0, 1, 1], [], []>} : vector<128x128xbf16>, vector<128x128xbf16>, vector<128x128xf32> -> vector<128x128xf32>
    %cst_17 = arith.constant 0.000000e+00 : f32
    %20 = vector.broadcast %cst_17 : f32 to vector<128x128xf32>
    %21 = arith.maximumf %19, %20 : vector<128x128xf32>
    %22 = arith.truncf %21 : vector<128x128xf32> to vector<128x128xbf16>
    %c0_18 = arith.constant 0 : index
    %c0_19 = arith.constant 0 : index
    %23 = vector.load %arg6[%c0_18, %c0_19] : memref<128x128xbf16, #tpu.memory_space<vmem>>, vector<128x128xbf16>
    %cst_20 = arith.constant dense<0.000000e+00> : vector<128x128xf32>
    %24 = tpu.matmul %22, %23, %cst_20 {dimension_numbers = #tpu.dot_dimension_numbers<[1], [0], [0], [1], [0, 0, 1, 1], [], []>} : vector<128x128xbf16>, vector<128x128xbf16>, vector<128x128xf32> -> vector<128x128xf32>
    %c0_21 = arith.constant 0 : index
    %c0_22 = arith.constant 0 : index
    %25 = vector.load %arg7[%c0_21, %c0_22] : memref<1x128xf32, #tpu.memory_space<vmem>>, vector<1x128xf32>
    %26 = vector.broadcast %25 : vector<1x128xf32> to vector<128x128xf32>
    %27 = arith.addf %24, %26 : vector<128x128xf32>
    %c0_23 = arith.constant 0 : index
    %c0_24 = arith.constant 0 : index
    %28 = vector.load %arg1[%c0_23, %c0_24] : memref<128x128xbf16, #tpu.memory_space<vmem>>, vector<128x128xbf16>
    %29 = arith.truncf %27 : vector<128x128xf32> to vector<128x128xbf16>
    %cst_25 = arith.constant dense<0.000000e+00> : vector<128x128xf32>
    %30 = tpu.matmul %28, %29, %cst_25 {dimension_numbers = #tpu.dot_dimension_numbers<[1], [0], [0], [1], [0, 0, 1, 1], [], []>} : vector<128x128xbf16>, vector<128x128xbf16>, vector<128x128xf32> -> vector<128x128xf32>
    %c0_26 = arith.constant 0 : index
    %c0_27 = arith.constant 0 : index
    %31 = vector.load %arg10[%c0_26, %c0_27] : memref<128x128xf32, #tpu.memory_space<vmem>>, vector<128x128xf32>
    tpu.vector_store %arg10[%c0_26, %c0_27], %30 {strides = array<i32>} : memref<128x128xf32, #tpu.memory_space<vmem>>, vector<128x128xf32>,
    %c0_28 = arith.constant 0 : index
    %c0_29 = arith.constant 0 : index
    %32 = vector.load %arg8[%c0_28, %c0_29] : memref<128x128xf32, #tpu.memory_space<vmem>>, vector<128x128xf32>
    %cst_30 = arith.constant dense<0.000000e+00> : vector<128x128xf32>
    %33 = tpu.matmul %30, %32, %cst_30 {dimension_numbers = #tpu.dot_dimension_numbers<[1], [0], [0], [1], [0, 0, 1, 1], [], []>} : vector<128x128xf32>, vector<128x128xf32>, vector<128x128xf32> -> vector<128x128xf32>
    %34 = arith.mulf %30, %30 : vector<128x128xf32>
    %cst_31 = arith.constant dense<0.000000e+00> : vector<128xf32>
    %35 = vector.multi_reduction <add>, %34, %cst_31 [1] : vector<128x128xf32> to vector<128xf32>
    %36 = vector.shape_cast %35 : vector<128xf32> to vector<128x1xf32>
    %37 = arith.mulf %32, %32 : vector<128x128xf32>
    %cst_32 = arith.constant dense<0.000000e+00> : vector<128xf32>
    %38 = vector.multi_reduction <add>, %37, %cst_32 [0] : vector<128x128xf32> to vector<128xf32>
    %39 = vector.shape_cast %38 : vector<128xf32> to vector<1x128xf32>
    %40 = math.sqrt %39 : vector<1x128xf32>
    %41 = math.sqrt %36 : vector<128x1xf32>
    %42 = vector.broadcast %36 : vector<128x1xf32> to vector<128x128xf32>
    %43 = vector.broadcast %39 : vector<1x128xf32> to vector<128x128xf32>
    %44 = arith.addf %42, %43 : vector<128x128xf32>
    %cst_33 = arith.constant 2.000000e+00 : f32
    %45 = vector.broadcast %cst_33 : f32 to vector<128x128xf32>
    %46 = arith.mulf %45, %33 : vector<128x128xf32>
    %47 = arith.subf %44, %46 : vector<128x128xf32>
    %cst_34 = arith.constant 0.000000e+00 : f32
    %48 = vector.broadcast %cst_34 : f32 to vector<128x128xf32>
    %49 = arith.maximumf %47, %48 : vector<128x128xf32>
    %50 = math.sqrt %49 : vector<128x128xf32>
    %cst_35 = arith.constant 0.000000e+00 : f32
    %51 = vector.broadcast %cst_35 : f32 to vector<128x128xf32>
    %52 = arith.subf %51, %50 : vector<128x128xf32>
    %cst_36 = arith.constant 9.99999997E-7 : f32
    %53 = vector.broadcast %cst_36 : f32 to vector<128x1xf32>
    %54 = arith.maximumf %41, %53 : vector<128x1xf32>
    %cst_37 = arith.constant 9.99999997E-7 : f32
    %55 = vector.broadcast %cst_37 : f32 to vector<1x128xf32>
    %56 = arith.maximumf %40, %55 : vector<1x128xf32>
    %57 = vector.broadcast %54 : vector<128x1xf32> to vector<128x128xf32>
    %58 = vector.broadcast %56 : vector<1x128xf32> to vector<128x128xf32>
    %59 = arith.mulf %57, %58 : vector<128x128xf32>
    %60 = arith.divf %33, %59 : vector<128x128xf32>
    %61 = tpu.iota {dimensions = array<i32: 1>} : vector<128x128xi32>
    %c8_i32 = arith.constant 8 : i32
    %62 = vector.broadcast %c8_i32 : i32 to vector<128x128xi32>
    %63 = arith.cmpi slt, %61, %62 : vector<128x128xi32>
    %cst_38 = arith.constant -1.000000e+30 : f32
    %64 = vector.broadcast %cst_38 : f32 to vector<128x128xf32>
    %65 = arith.select %63, %52, %64 : vector<128x128xi1>, vector<128x128xf32>
    %c8_i32_39 = arith.constant 8 : i32
    %66 = vector.broadcast %c8_i32_39 : i32 to vector<128x128xi32>
    %67 = arith.cmpi slt, %61, %66 : vector<128x128xi32>
    %cst_40 = arith.constant -1.000000e+30 : f32
    %68 = vector.broadcast %cst_40 : f32 to vector<128x128xf32>
    %69 = arith.select %67, %60, %68 : vector<128x128xi1>, vector<128x128xf32>
    %cst_41 = arith.constant dense<0xFF800000> : vector<128xf32>
    %70 = vector.multi_reduction <maximumf>, %65, %cst_41 [1] : vector<128x128xf32> to vector<128xf32>
    %71 = vector.shape_cast %70 : vector<128xf32> to vector<128x1xf32>
    %72 = vector.broadcast %71 : vector<128x1xf32> to vector<128x128xf32>
    %73 = arith.subf %65, %72 : vector<128x128xf32>
    %74 = math.exp %73 : vector<128x128xf32>
    %cst_42 = arith.constant dense<0.000000e+00> : vector<128xf32>
    %75 = vector.multi_reduction <add>, %74, %cst_42 [1] : vector<128x128xf32> to vector<128xf32>
    %76 = vector.shape_cast %75 : vector<128xf32> to vector<128x1xf32>
    %77 = math.log %76 : vector<128x1xf32>
    %78 = vector.broadcast %77 : vector<128x1xf32> to vector<128x128xf32>
    %79 = arith.subf %73, %78 : vector<128x128xf32>
    %cst_43 = arith.constant dense<0xFF800000> : vector<128xf32>
    %80 = vector.multi_reduction <maximumf>, %69, %cst_43 [1] : vector<128x128xf32> to vector<128xf32>
    %81 = vector.shape_cast %80 : vector<128xf32> to vector<128x1xf32>
    %82 = vector.broadcast %81 : vector<128x1xf32> to vector<128x128xf32>
    %83 = arith.subf %69, %82 : vector<128x128xf32>
    %84 = math.exp %83 : vector<128x128xf32>
    %cst_44 = arith.constant dense<0.000000e+00> : vector<128xf32>
    %85 = vector.multi_reduction <add>, %84, %cst_44 [1] : vector<128x128xf32> to vector<128xf32>
    %86 = vector.shape_cast %85 : vector<128xf32> to vector<128x1xf32>
    %87 = math.log %86 : vector<128x1xf32>
    %88 = vector.broadcast %87 : vector<128x1xf32> to vector<128x128xf32>
    %89 = arith.subf %83, %88 : vector<128x128xf32>
    %90 = arith.addf %79, %89 : vector<128x128xf32>
    %cst_45 = arith.constant 5.000000e-01 : f32
    %91 = vector.broadcast %cst_45 : f32 to vector<128x128xf32>
    %92 = arith.mulf %91, %90 : vector<128x128xf32>
    %c0_46 = arith.constant 0 : index
    %c0_47 = arith.constant 0 : index
    %93 = vector.load %arg9[%c0_46, %c0_47] : memref<128x128xf32, #tpu.memory_space<vmem>>, vector<128x128xf32>
    tpu.vector_store %arg9[%c0_46, %c0_47], %33 {strides = array<i32>} : memref<128x128xf32, #tpu.memory_space<vmem>>, vector<128x128xf32>,
    %c0_48 = arith.constant 0 : index
    %c0_49 = arith.constant 0 : index
    %94 = vector.load %arg11[%c0_48, %c0_49] : memref<128x128xf32, #tpu.memory_space<vmem>>, vector<128x128xf32>
    tpu.vector_store %arg11[%c0_48, %c0_49], %92 {strides = array<i32>} : memref<128x128xf32, #tpu.memory_space<vmem>>, vector<128x128xf32>,
    return
  }
}

</mosaic_0001>

<bundles_post_ra>
// kernel: tpu_custom_call.1
= control target key start
LH: loop header
LB: loop body
LE: loop exit
PB: predicated region body
PF: predicated region fallthrough
CT: control target
= control target key end

     0   :  { %17 = vsyncpa [#allocation3], 0  ;;  %s4255_s0 = inlined_call_operand.hbm [shape: bf16[128,128], index: 0, kind: input, shape index: {}]   ;;  %s4256_s1 = inlined_call_operand.hbm [shape: bf16[128,128], index: 1, kind: input, shape index: {}]   ;;  %s4257_s2 = inlined_call_operand.hbm [shape: bf16[128,128], index: 2, kind: input, shape index: {}]   ;;  %s4258_s3 = inlined_call_operand.vmem [shape: f32[1,128], index: 3, kind: input, shape index: {}]   ;;  %s4259_s4 = inlined_call_operand.hbm [shape: bf16[128,128], index: 4, kind: input, shape index: {}]   ;;  %s4260_s5 = inlined_call_operand.vmem [shape: f32[1,128], index: 5, kind: input, shape index: {}]   ;;  %s4261_s6 = inlined_call_operand.hbm [shape: bf16[128,128], index: 6, kind: input, shape index: {}]   ;;  %s4262_s7 = inlined_call_operand.vmem [shape: f32[1,128], index: 7, kind: input, shape index: {}]   ;;  %s4263_s8 = inlined_call_operand.hbm [shape: f32[128,128], index: 8, kind: input, shape index: {}]   ;;  %s4264_s9 = inlined_call_operand.hbm [shape: f32[128,128], index: 9, kind: output, shape index: {0}]   ;;  %s4265_s10 = inlined_call_operand.hbm [shape: f32[128,128], index: 10, kind: output, shape index: {1}]   ;;  %s4266_s11 = inlined_call_operand.hbm [shape: f32[128,128], index: 11, kind: output, shape index: {2}]  }
   0x1   :  { %18 = vsyncpa [#allocation6], 0 }
   0x2   :  { %19 = vsyncpa [#allocation9], 0 }
   0x3   :  { %20 = vsyncpa [#allocation12], 0 }
   0x4   :  { %21 = vsyncpa [#allocation4], 0 }
   0x5   :  { %22 = vsyncpa [#allocation15], 0  ;;  %s3145_s17 = smov [#allocation5]   ;;  %s3146_s19 = smov [#allocation8]  }
   0x6   :  { %s40_s18 = sshll.u32 %s3145_s17, 4  ;;  %s66_s20 = sshll.u32 %s3146_s19, 4  ;;  %s41_s18 = int_to_ptr.vmem [resolvable:$true] %s40_s18  ;;  %s67_s20 = int_to_ptr.vmem [resolvable:$true] %s66_s20 }
   0x7   :  { %s2961_s21 = scalar_lea.vmem %s41_s18, 1024  ;;  %p2966_p1 = scmp.lt.s32.totalorder %s41_s18, %s41_s18 }
   0x8   :  { %p2962_p0 = scmp.ne.s32.totalorder %s41_s18, %s2961_s21  ;;  %p2967_p2 = scmp.lt.s32.totalorder %s2961_s21, %s2961_s21 }
   0xa   :  { %p2968_p3 = por %p2967_p2, %p2966_p1 }
   0xc   :  { %p2969_p4 = pnand %p2968_p3, %p2962_p0 }
   0xe   :  { %2972 = shalt.err (!%p2969_p4)
}
   0xf   :  { %s3147_s22 = smov 64   ;;  %s3148_s23 = smov 4  }
  0x10   :  { %46 = dma.hbm_to_vmem [thread:$0]  %s4256_s1, 1024, %s41_s18, [#allocation6], %s3147_s22, %s3147_s22, %s3148_s23  }
  0x11   :  { %s2981_s26 = scalar_lea.vmem %s67_s20, 1024  ;;  %p2986_p6 = scmp.lt.s32.totalorder %s67_s20, %s67_s20 }
  0x12   :  { %p2982_p5 = scmp.ne.s32.totalorder %s67_s20, %s2981_s26  ;;  %p2987_p7 = scmp.lt.s32.totalorder %s2981_s26, %s2981_s26 }
  0x14   :  { %p2988_p8 = por %p2987_p7, %p2986_p6 }
  0x16   :  { %p2989_p9 = pnand %p2988_p8, %p2982_p5 }
  0x18   :  { %2992 = shalt.err (!%p2989_p9)
}
  0x19   :  { %72 = dma.hbm_to_vmem [thread:$0]  %s4259_s4, 1024, %s67_s20, [#allocation9], %s3147_s22, %s3147_s22, %s3148_s23  }
  0x1a   :  { %s3149_s29 = smov [#allocation2]   ;;  %s3150_s12 = smov [#allocation7]  }
  0x1b   :  { %s28_s30 = sshll.u32 %s3149_s29, 4  ;;  %s52_s13 = sshll.u32 %s3150_s12, 4  ;;  %s29_s30 = int_to_ptr.vmem [resolvable:$true] %s28_s30  ;;  %s53_s13 = int_to_ptr.vmem [resolvable:$true] %s52_s13 }
  0x1c   :  { %s3001_s1 = scalar_lea.vmem %s29_s30, 1024  ;;  %p3006_p11 = scmp.lt.s32.totalorder %s29_s30, %s29_s30 }
  0x1d   :  { %p3002_p10 = scmp.ne.s32.totalorder %s29_s30, %s3001_s1  ;;  %p3007_p12 = scmp.lt.s32.totalorder %s3001_s1, %s3001_s1 }
  0x1f   :  { %p3008_p13 = por %p3007_p12, %p3006_p11 }
  0x21   :  { %p3009_p0 = pnand %p3008_p13, %p3002_p10 }
  0x23   :  { %3012 = shalt.err (!%p3009_p0)
}
  0x24   :  { %34 = dma.hbm_to_vmem [thread:$0]  %s4255_s0, 1024, %s29_s30, [#allocation3], %s3147_s22, %s3147_s22, %s3148_s23  }
  0x25   :  { %s3021_s4 = scalar_lea.vmem %s53_s13, 1024  ;;  %p3026_p2 = scmp.lt.s32.totalorder %s53_s13, %s53_s13 }
  0x26   :  { %p3022_p1 = scmp.ne.s32.totalorder %s53_s13, %s3021_s4  ;;  %p3027_p3 = scmp.lt.s32.totalorder %s3021_s4, %s3021_s4 }
  0x28   :  { %p3028_p4 = por %p3027_p3, %p3026_p2 }
  0x2a   :  { %p3029_p5 = pnand %p3028_p4, %p3022_p1 }
  0x2c   :  { %3032 = shalt.err (!%p3029_p5)
}
  0x2d   :  { %58 = dma.hbm_to_vmem [thread:$0]  %s4257_s2, 1024, %s53_s13, [#allocation6], %s3147_s22, %s3147_s22, %s3148_s23  }
  0x2e   :  { %s3151_s18 = smov [#allocation10]   ;;  %s3152_s20 = smov [#allocation11]  }
  0x2f   :  { %s80_s19 = sshll.u32 %s3151_s18, 4  ;;  %s94_s21 = sshll.u32 %s3152_s20, 4  ;;  %s81_s19 = int_to_ptr.vmem [resolvable:$true] %s80_s19  ;;  %s95_s21 = int_to_ptr.vmem [resolvable:$true] %s94_s21 }
  0x30   :  { %s3041_s0 = scalar_lea.vmem %s81_s19, 1024  ;;  %p3046_p7 = scmp.lt.s32.totalorder %s81_s19, %s81_s19 }
  0x31   :  { %p3042_p6 = scmp.ne.s32.totalorder %s81_s19, %s3041_s0  ;;  %p3047_p8 = scmp.lt.s32.totalorder %s3041_s0, %s3041_s0 }
  0x33   :  { %p3048_p9 = por %p3047_p8, %p3046_p7 }
  0x35   :  { %p3049_p10 = pnand %p3048_p9, %p3042_p6 }
  0x37   :  { %3052 = shalt.err (!%p3049_p10)
}
  0x38   :  { %86 = dma.hbm_to_vmem [thread:$0]  %s4261_s6, 1024, %s81_s19, [#allocation9], %s3147_s22, %s3147_s22, %s3148_s23  }
  0x39   :  { %s3061_s2 = scalar_lea.vmem %s95_s21, 2048  ;;  %p3066_p12 = scmp.lt.s32.totalorder %s95_s21, %s95_s21 }
  0x3a   :  { %p3062_p11 = scmp.ne.s32.totalorder %s95_s21, %s3061_s2  ;;  %p3067_p13 = scmp.lt.s32.totalorder %s3061_s2, %s3061_s2 }
  0x3c   :  { %p3068_p0 = por %p3067_p13, %p3066_p12 }
  0x3e   :  { %p3069_p1 = pnand %p3068_p0, %p3062_p11 }
  0x40   :  { %3072 = shalt.err (!%p3069_p1)
}
  0x41   :  { %s3153_s26 = smov 128   ;;  %s3154_s27 = smov 8  }
  0x42   :  { %100 = dma.hbm_to_vmem [thread:$0]  %s4263_s8, 2048, %s95_s21, [#allocation12], %s3153_s26, %s3153_s26, %s3154_s27  }
  0x43   :  { %3133 = dma.done.wait [#allocation3], 1024  }
  0x44   :  { %3134 = vsyncadd [#allocation3], 4294966272 }
  0x45   :  { %3135 = dma.done.wait [#allocation6], 2048  }
  0x46   :  { %3136 = vsyncadd [#allocation6], 4294965248 }
  0x47   :  { %3137 = dma.done.wait [#allocation9], 2048  }
  0x48   :  { %3138 = vsyncadd [#allocation9], 4294965248 }
  0x49   :  { %3139 = dma.done.wait [#allocation12], 2048  }
  0x4a   :  { %3140 = vsyncadd [#allocation12], 4294965248  ;;  %v2687_v0 = vld [vmem:[#allocation7 + $0x38] sm:$0xff]   ;;  %v2688_v1 = vld [vmem:[#allocation7 + $0x30] sm:$0xff]   ;;  %s3156_s12 = smov [#allocation13]  }
  0x4b   :  { %2394 = vmatprep.subr.bf16.mxu0 %v2687_v0  ;;  %v2689_v2 = vld [vmem:[#allocation7 + $0x28] sm:$0xff]   ;;  %v2690_v3 = vld [vmem:[#allocation7 + $0x20] sm:$0xff]   ;;  %v2691_v5 = vld [vmem:[#allocation7 + $0x18] sm:$0xff]   ;;  %s2177_s13 = sshll.u32 %s3156_s12, 4  ;;  %s2178_s13 = int_to_ptr.vmem [resolvable:$true] %s2177_s13 }
  0x4c   :  { %2395 = vmatpush3.bf16.msra.mxu0 %v2687_v0  ;;  %v2695_v4 = vld [vmem:[#allocation2] sm:$0xff]   ;;  %v2692_v6 = vld [vmem:[#allocation7 + $0x10] sm:$0xff]   ;;  %v2693_v7 = vld [vmem:[#allocation7 + $0x8] sm:$0xff]  }
  0x4d   :  { %2396 = vmatprep.subr.bf16.mxu0 %v2688_v1  ;;  %2410 = vmatprep.mubr.bf16.mxu0 %v2695_v4  ;;  %v2694_v8 = vld [vmem:[#allocation7] sm:$0xff]   ;;  %v2696_v9 = vld [vmem:[#allocation2 + $0x8] sm:$0xff]   ;;  %v2697_v10 = vld [vmem:[#allocation2 + $0x10] sm:$0xff]  }
  0x4e   :  { %v2698_v11 = vld [vmem:[#allocation2 + $0x18] sm:$0xff]   ;;  %v2699_v12 = vld [vmem:[#allocation2 + $0x20] sm:$0xff]   ;;  %v2700_v13 = vld [vmem:[#allocation2 + $0x28] sm:$0xff]  }
  0x4f   :  { %v2701_v14 = vld [vmem:[#allocation2 + $0x30] sm:$0xff]   ;;  %v2702_v15 = vld [vmem:[#allocation2 + $0x38] sm:$0xff]   ;;  %v3254_v16 = vld [vmem:[#allocation5] sm:$0xff]  }
  0x50   :  { %2397 = vmatpush3.bf16.msra.mxu0 %v2688_v1  ;;  %2442 = vmatprep.mubr.bf16.mxu1 %v3254_v16  ;;  %v2711_v17 = vld [vmem:[#allocation8 + $0x38] sm:$0xff]   ;;  %v2712_v18 = vld [vmem:[#allocation8 + $0x30] sm:$0xff]   ;;  %v2713_v19 = vld [vmem:[#allocation8 + $0x28] sm:$0xff]  }
  0x51   :  { %2398 = vmatprep.subr.bf16.mxu0 %v2689_v2  ;;  %v2714_v20 = vld [vmem:[#allocation8 + $0x20] sm:$0xff]   ;;  %v2715_v21 = vld [vmem:[#allocation8 + $0x18] sm:$0xff]   ;;  %v3260_v63 = vld [vmem:[#allocation5 + $0x8] sm:$0xff]  }
  0x52   :  { %v2223_v36 = vld [vmem:[%s4258_s3] ss:$0 sm:$0xff]  ;;  %v3262_v0 = vld [vmem:[#allocation5 + $0x10] sm:$0xff]   ;;  %v3266_v1 = vld [vmem:[#allocation5 + $0x18] sm:$0xff]  }
  0x53   :  { %v3274_v4 = vld [vmem:[#allocation5 + $0x30] sm:$0xff]  }
  0x54   :  { %2399 = vmatpush3.bf16.msra.mxu0 %v2689_v2  ;;  %v3268_v2 = vld [vmem:[#allocation5 + $0x20] sm:$0xff]  }
  0x55   :  { %2400 = vmatprep.subr.bf16.mxu0 %v2690_v3 }
  0x58   :  { %2401 = vmatpush3.bf16.msra.mxu0 %v2690_v3  ;;  %v3272_v3 = vld [vmem:[#allocation5 + $0x28] sm:$0xff]  }
  0x59   :  { %2402 = vmatprep.subr.bf16.mxu0 %v2691_v5 }
  0x5c   :  { %2403 = vmatpush3.bf16.msra.mxu0 %v2691_v5  ;;  %v3278_v5 = vld [vmem:[#allocation5 + $0x38] sm:$0xff]  }
  0x5d   :  { %2404 = vmatprep.subr.bf16.mxu0 %v2692_v6 }
  0x60   :  { %2405 = vmatpush3.bf16.msra.mxu0 %v2692_v6  ;;  %v2716_v6 = vld [vmem:[#allocation8 + $0x10] sm:$0xff]  }
  0x61   :  { %2406 = vmatprep.subr.bf16.mxu0 %v2693_v7 }
  0x64   :  { %2407 = vmatpush3.bf16.msra.mxu0 %v2693_v7  ;;  %v2717_v7 = vld [vmem:[#allocation8 + $0x8] sm:$0xff]  }
  0x65   :  { %2408 = vmatprep.subr.bf16.mxu0 %v2694_v8 }
  0x68   :  { %2409 = vmatpush3.bf16.msra.mxu0 %v2694_v8  ;;  %v2718_v8 = vld [vmem:[#allocation8] sm:$0xff]  }
  0x69   :  { %2458 = vmatprep.subr.bf16.mxu0 %v2711_v17 }
  0x6b   :  { %2411 = vmatmul.mubr.bf16.vlgmr.msra.gmra.mxu0 %v2696_v9 }
  0x6c   :  { %2414 = vmatprep.mubr.bf16.mxu0 %v2697_v10  ;;  %2459 = vmatpush3.bf16.msra.mxu0 %v2711_v17 }
  0x6d   :  { %2460 = vmatprep.subr.bf16.mxu0 %v2712_v18 }
  0x70   :  { %2461 = vmatpush3.bf16.msra.mxu0 %v2712_v18 }
  0x71   :  { %2462 = vmatprep.subr.bf16.mxu0 %v2713_v19 }
  0x73   :  { %2415 = vmatmul.mubr.bf16.gmra.mxu0 %v2698_v11 }
  0x74   :  { %2418 = vmatprep.mubr.bf16.mxu0 %v2699_v12  ;;  %2463 = vmatpush3.bf16.msra.mxu0 %v2713_v19 }
  0x75   :  { %2464 = vmatprep.subr.bf16.mxu0 %v2714_v20 }
  0x78   :  { %2465 = vmatpush3.bf16.msra.mxu0 %v2714_v20 }
  0x79   :  { %2466 = vmatprep.subr.bf16.mxu0 %v2715_v21 }
  0x7b   :  { %2419 = vmatmul.mubr.bf16.gmra.mxu0 %v2700_v13 }
  0x7c   :  { %2422 = vmatprep.mubr.bf16.mxu0 %v2701_v14  ;;  %2467 = vmatpush3.bf16.msra.mxu0 %v2715_v21 }
  0x7d   :  { %2468 = vmatprep.subr.bf16.mxu0 %v2716_v6 }
  0x80   :  { %2469 = vmatpush3.bf16.msra.mxu0 %v2716_v6 }
  0x81   :  { %2470 = vmatprep.subr.bf16.mxu0 %v2717_v7 }
  0x83   :  { %2423 = vmatmul.mubr.bf16.gmra.mxu0 %v2702_v15 }
  0x84   :  { %2471 = vmatpush3.bf16.msra.mxu0 %v2717_v7 }
  0x85   :  { %2472 = vmatprep.subr.bf16.mxu0 %v2718_v8 }
  0x88   :  { %2473 = vmatpush3.bf16.msra.mxu0 %v2718_v8 }
 0x12b   :  { %v2412_v22 = vpop.f32.mrf.mxu0 }
 0x12c   :  { %v298_v58 = vadd.f32 %v2412_v22, %v2223_v36 }
 0x12d   :  { %v289_v23 = vpop.f32.mrf.mxu0 }
 0x12e   :  { %v290_v61 = vadd.f32 %v2223_v36, %v289_v23 }
 0x12f   :  { %v2413_v24 = vpop.f32.mrf.mxu0 }
 0x130   :  { %v301_v56 = vadd.f32 %v2413_v24, %v2223_v36 }
 0x131   :  { %v292_v25 = vpop.f32.mrf.mxu0 }
 0x132   :  { %v369_v59 = vpack.c.bf16 %v301_v56, %v298_v58  ;;  %v293_v60 = vadd.f32 %v2223_v36, %v292_v25 }
 0x133   :  { %v2416_v26 = vpop.f32.mrf.mxu0 }
 0x134   :  { %v314_v52 = vadd.f32 %v2416_v26, %v2223_v36  ;;  %v368_v62 = vpack.c.bf16 %v293_v60, %v290_v61 }
 0x135   :  { %v305_v27 = vpop.f32.mrf.mxu0 }
 0x136   :  { %v306_v55 = vadd.f32 %v2223_v36, %v305_v27 }
 0x137   :  { %v2417_v28 = vpop.f32.mrf.mxu0 }
 0x138   :  { %v317_v50 = vadd.f32 %v2417_v28, %v2223_v36 }
 0x139   :  { %v308_v29 = vpop.f32.mrf.mxu0 }
 0x13a   :  { %v371_v53 = vpack.c.bf16 %v317_v50, %v314_v52  ;;  %v309_v54 = vadd.f32 %v2223_v36, %v308_v29  ;;  %v2719_v50 = vld [vmem:[#allocation10 + $0x38] sm:$0xff]   ;;  %v2721_v52 = vld [vmem:[#allocation10 + $0x28] sm:$0xff]  }
 0x13b   :  { %v2420_v30 = vpop.f32.mrf.mxu0  ;;  %2522 = vmatprep.subr.bf16.mxu0 %v2719_v50 }
 0x13c   :  { %v330_v46 = vadd.f32 %v2420_v30, %v2223_v36  ;;  %v370_v57 = vpack.c.bf16 %v309_v54, %v306_v55  ;;  %v2723_v54 = vld [vmem:[#allocation10 + $0x18] sm:$0xff]  }
 0x13d   :  { %v321_v31 = vpop.f32.mrf.mxu0 }
 0x13e   :  { %v322_v49 = vadd.f32 %v2223_v36, %v321_v31 }
 0x13f   :  { %v2421_v32 = vpop.f32.mrf.mxu0 }
 0x140   :  { %v333_v44 = vadd.f32 %v2421_v32, %v2223_v36 }
 0x141   :  { %v324_v33 = vpop.f32.mrf.mxu0 }
 0x142   :  { %v373_v47 = vpack.c.bf16 %v333_v44, %v330_v46  ;;  %v325_v48 = vadd.f32 %v2223_v36, %v324_v33 }
 0x143   :  { %v2424_v34 = vpop.f32.mrf.mxu0 }
 0x144   :  { %v346_v38 = vadd.f32 %v2424_v34, %v2223_v36  ;;  %v372_v51 = vpack.c.bf16 %v325_v48, %v322_v49 }
 0x145   :  { %v337_v35 = vpop.f32.mrf.mxu0 }
 0x146   :  { %v338_v41 = vadd.f32 %v2223_v36, %v337_v35 }
 0x147   :  { %v2425_v37 = vpop.f32.mrf.mxu0 }
 0x148   :  { %v349_v39 = vadd.f32 %v2425_v37, %v2223_v36 }
 0x149   :  { %v340_v40 = vpop.f32.mrf.mxu0 }
 0x14a   :  { %v341_v42 = vadd.f32 %v2223_v36, %v340_v40  ;;  %v375_v43 = vpack.c.bf16 %v349_v39, %v346_v38 }
 0x14c   :  { %v374_v45 = vpack.c.bf16 %v341_v42, %v338_v41  ;;  %2426 = vmatprep.subr.bf16.mxu1 %v375_v43 }
 0x14d   :  { %2427 = vmatpush3.bf16.msra.mxu1 %v375_v43 }
 0x14e   :  { %2428 = vmatprep.subr.bf16.mxu1 %v374_v45 }
 0x151   :  { %2429 = vmatpush3.bf16.msra.mxu1 %v374_v45 }
 0x152   :  { %2430 = vmatprep.subr.bf16.mxu1 %v373_v47 }
 0x155   :  { %2431 = vmatpush3.bf16.msra.mxu1 %v373_v47 }
 0x156   :  { %2432 = vmatprep.subr.bf16.mxu1 %v372_v51 }
 0x159   :  { %2433 = vmatpush3.bf16.msra.mxu1 %v372_v51  ;;  %v2720_v51 = vld [vmem:[#allocation10 + $0x30] sm:$0xff]  }
 0x15a   :  { %2434 = vmatprep.subr.bf16.mxu1 %v371_v53 }
 0x15d   :  { %2435 = vmatpush3.bf16.msra.mxu1 %v371_v53  ;;  %v2722_v53 = vld [vmem:[#allocation10 + $0x20] sm:$0xff]  }
 0x15e   :  { %2436 = vmatprep.subr.bf16.mxu1 %v370_v57 }
 0x161   :  { %2437 = vmatpush3.bf16.msra.mxu1 %v370_v57 }
 0x162   :  { %2438 = vmatprep.subr.bf16.mxu1 %v369_v59 }
 0x165   :  { %2439 = vmatpush3.bf16.msra.mxu1 %v369_v59 }
 0x166   :  { %2440 = vmatprep.subr.bf16.mxu1 %v368_v62 }
 0x169   :  { %2441 = vmatpush3.bf16.msra.mxu1 %v368_v62 }
 0x16c   :  { %2443 = vmatmul.mubr.bf16.vlgmr.msra.gmra.mxu1 %v3260_v63 }
 0x16d   :  { %2446 = vmatprep.mubr.bf16.mxu1 %v3262_v0 }
 0x174   :  { %2447 = vmatmul.mubr.bf16.gmra.mxu1 %v3266_v1 }
 0x175   :  { %2450 = vmatprep.mubr.bf16.mxu1 %v3268_v2 }
 0x17c   :  { %2451 = vmatmul.mubr.bf16.gmra.mxu1 %v3272_v3 }
 0x17d   :  { %2454 = vmatprep.mubr.bf16.mxu1 %v3274_v4 }
 0x184   :  { %2455 = vmatmul.mubr.bf16.gmra.mxu1 %v3278_v5 }
 0x185   :  { %2506 = vmatprep.mubr.bf16.mxu1 %v3254_v16 }
 0x22c   :  { %v2444_v9 = vpop.f32.mrf.mxu1 }
 0x22d   :  { %v523_v17 = vmax.f32 %v2444_v9, 0.0 }
 0x22e   :  { %v458_v10 = vpop.f32.mrf.mxu1 }
 0x22f   :  { %v521_v14 = vmax.f32 %v458_v10, 0.0 }
 0x230   :  { %v2445_v11 = vpop.f32.mrf.mxu1 }
 0x231   :  { %v524_v12 = vmax.f32 %v2445_v11, 0.0 }
 0x232   :  { %v461_v13 = vpop.f32.mrf.mxu1 }
 0x233   :  { %v522_v15 = vmax.f32 %v461_v13, 0.0  ;;  %v538_v20 = vpack.c.bf16 %v524_v12, %v523_v17  ;;  %v2248_v12 = vld [vmem:[%s4260_s5] ss:$0 sm:$0xff] }
 0x234   :  { %v2448_v18 = vpop.f32.mrf.mxu1 }
 0x235   :  { %v537_v19 = vpack.c.bf16 %v522_v15, %v521_v14  ;;  %v527_v27 = vmax.f32 %v2448_v18, 0.0 }
 0x236   :  { %v474_v21 = vpop.f32.mrf.mxu1 }
 0x237   :  { %2474 = vmatprep.mubr.bf16.mxu0 %v537_v19  ;;  %v525_v25 = vmax.f32 %v474_v21, 0.0 }
 0x238   :  { %v2449_v22 = vpop.f32.mrf.mxu1  ;;  %2475 = vmatmul.mubr.bf16.vlgmr.msra.gmra.mxu0 %v538_v20 }
 0x239   :  { %v528_v23 = vmax.f32 %v2449_v22, 0.0  ;;  %2523 = vmatpush3.bf16.msra.mxu0 %v2719_v50 }
 0x23a   :  { %v477_v24 = vpop.f32.mrf.mxu1  ;;  %2524 = vmatprep.subr.bf16.mxu0 %v2720_v51 }
 0x23b   :  { %v526_v26 = vmax.f32 %v477_v24, 0.0  ;;  %v540_v30 = vpack.c.bf16 %v528_v23, %v527_v27 }
 0x23c   :  { %v2452_v28 = vpop.f32.mrf.mxu1 }
 0x23d   :  { %v539_v29 = vpack.c.bf16 %v526_v26, %v525_v25  ;;  %v531_v37 = vmax.f32 %v2452_v28, 0.0  ;;  %2525 = vmatpush3.bf16.msra.mxu0 %v2720_v51 }
 0x23e   :  { %v490_v31 = vpop.f32.mrf.mxu1  ;;  %2526 = vmatprep.subr.bf16.mxu0 %v2721_v52 }
 0x23f   :  { %2478 = vmatprep.mubr.bf16.mxu0 %v539_v29  ;;  %v529_v35 = vmax.f32 %v490_v31, 0.0 }
 0x240   :  { %v2453_v32 = vpop.f32.mrf.mxu1  ;;  %2479 = vmatmul.mubr.bf16.gmra.mxu0 %v540_v30 }
 0x241   :  { %v532_v33 = vmax.f32 %v2453_v32, 0.0  ;;  %2527 = vmatpush3.bf16.msra.mxu0 %v2721_v52 }
 0x242   :  { %v493_v34 = vpop.f32.mrf.mxu1  ;;  %2528 = vmatprep.subr.bf16.mxu0 %v2722_v53 }
 0x243   :  { %v530_v36 = vmax.f32 %v493_v34, 0.0  ;;  %v542_v40 = vpack.c.bf16 %v532_v33, %v531_v37 }
 0x244   :  { %v2456_v38 = vpop.f32.mrf.mxu1 }
 0x245   :  { %v541_v39 = vpack.c.bf16 %v530_v36, %v529_v35  ;;  %v535_v47 = vmax.f32 %v2456_v38, 0.0  ;;  %2529 = vmatpush3.bf16.msra.mxu0 %v2722_v53 }
 0x246   :  { %v506_v41 = vpop.f32.mrf.mxu1  ;;  %2530 = vmatprep.subr.bf16.mxu0 %v2723_v54 }
 0x247   :  { %2482 = vmatprep.mubr.bf16.mxu0 %v541_v39  ;;  %v533_v45 = vmax.f32 %v506_v41, 0.0  ;;  %v2725_v41 = vld [vmem:[#allocation10 + $0x8] sm:$0xff]  }
 0x248   :  { %v2457_v42 = vpop.f32.mrf.mxu1  ;;  %2483 = vmatmul.mubr.bf16.gmra.mxu0 %v542_v40  ;;  %v2724_v40 = vld [vmem:[#allocation10 + $0x10] sm:$0xff]  }
 0x249   :  { %v536_v43 = vmax.f32 %v2457_v42, 0.0  ;;  %2531 = vmatpush3.bf16.msra.mxu0 %v2723_v54  ;;  %v2726_v42 = vld [vmem:[#allocation10] sm:$0xff]  }
 0x24a   :  { %v509_v44 = vpop.f32.mrf.mxu1  ;;  %2532 = vmatprep.subr.bf16.mxu0 %v2724_v40 }
 0x24b   :  { %v534_v46 = vmax.f32 %v509_v44, 0.0  ;;  %v544_v49 = vpack.c.bf16 %v536_v43, %v535_v47 }
 0x24d   :  { %v543_v48 = vpack.c.bf16 %v534_v46, %v533_v45  ;;  %2533 = vmatpush3.bf16.msra.mxu0 %v2724_v40 }
 0x24e   :  { %2534 = vmatprep.subr.bf16.mxu0 %v2725_v41 }
 0x24f   :  { %2486 = vmatprep.mubr.bf16.mxu0 %v543_v48 }
 0x250   :  { %2487 = vmatmul.mubr.bf16.gmra.mxu0 %v544_v49 }
 0x251   :  { %2535 = vmatpush3.bf16.msra.mxu0 %v2725_v41 }
 0x252   :  { %2536 = vmatprep.subr.bf16.mxu0 %v2726_v42 }
 0x255   :  { %2537 = vmatpush3.bf16.msra.mxu0 %v2726_v42 }
 0x2f8   :  { %v2476_v55 = vpop.f32.mrf.mxu0 }
 0x2f9   :  { %v659_v35 = vadd.f32 %v2476_v55, %v2248_v12 }
 0x2fa   :  { %v650_v56 = vpop.f32.mrf.mxu0 }
 0x2fb   :  { %v651_v38 = vadd.f32 %v2248_v12, %v650_v56 }
 0x2fc   :  { %v2477_v57 = vpop.f32.mrf.mxu0 }
 0x2fd   :  { %v662_v33 = vadd.f32 %v2477_v57, %v2248_v12 }
 0x2fe   :  { %v653_v58 = vpop.f32.mrf.mxu0 }
 0x2ff   :  { %v714_v36 = vpack.c.bf16 %v662_v33, %v659_v35  ;;  %v654_v37 = vadd.f32 %v2248_v12, %v653_v58  ;;  %v3319_v33 = vld [vmem:[#allocation11 + $0x40] sm:$0xff]  ;;  %v3327_v35 = vld [vmem:[#allocation11 + $0x30] sm:$0xff] }
 0x300   :  { %v2480_v59 = vpop.f32.mrf.mxu0 }
 0x301   :  { %v675_v29 = vadd.f32 %v2480_v59, %v2248_v12  ;;  %v713_v39 = vpack.c.bf16 %v654_v37, %v651_v38  ;;  %v3335_v37 = vld [vmem:[#allocation11 + $0x20] sm:$0xff]  ;;  %v3339_v38 = vld [vmem:[#allocation11 + $0x18] sm:$0xff] }
 0x302   :  { %v666_v60 = vpop.f32.mrf.mxu0 }
 0x303   :  { %v667_v32 = vadd.f32 %v2248_v12, %v666_v60 }
 0x304   :  { %v2481_v61 = vpop.f32.mrf.mxu0 }
 0x305   :  { %v678_v27 = vadd.f32 %v2481_v61, %v2248_v12 }
 0x306   :  { %v669_v62 = vpop.f32.mrf.mxu0 }
 0x307   :  { %v716_v30 = vpack.c.bf16 %v678_v27, %v675_v29  ;;  %v670_v31 = vadd.f32 %v2248_v12, %v669_v62  ;;  %v3295_v27 = vld [vmem:[#allocation11 + $0x70] sm:$0xff]  ;;  %v3303_v29 = vld [vmem:[#allocation11 + $0x60] sm:$0xff] }
 0x308   :  { %v2484_v6 = vpop.f32.mrf.mxu0 }
 0x309   :  { %v691_v23 = vadd.f32 %v2484_v6, %v2248_v12  ;;  %v715_v34 = vpack.c.bf16 %v670_v31, %v667_v32  ;;  %v3311_v31 = vld [vmem:[#allocation11 + $0x50] sm:$0xff]  ;;  %v3315_v32 = vld [vmem:[#allocation11 + $0x48] sm:$0xff] }
 0x30a   :  { %v682_v7 = vpop.f32.mrf.mxu0 }
 0x30b   :  { %v683_v26 = vadd.f32 %v2248_v12, %v682_v7 }
 0x30c   :  { %v2485_v8 = vpop.f32.mrf.mxu0 }
 0x30d   :  { %v694_v21 = vadd.f32 %v2485_v8, %v2248_v12 }
 0x30e   :  { %v685_v9 = vpop.f32.mrf.mxu0 }
 0x30f   :  { %v718_v24 = vpack.c.bf16 %v694_v21, %v691_v23  ;;  %v686_v25 = vadd.f32 %v2248_v12, %v685_v9 }
 0x310   :  { %v2488_v10 = vpop.f32.mrf.mxu0 }
 0x311   :  { %v707_v14 = vadd.f32 %v2488_v10, %v2248_v12  ;;  %v717_v28 = vpack.c.bf16 %v686_v25, %v683_v26  ;;  %v3293_v26 = vld [vmem:[#allocation11 + $0x78] sm:$0xff] }
 0x312   :  { %v698_v11 = vpop.f32.mrf.mxu0  ;;  %2586 = vmatprep.subr.mxu0 %v3293_v26 }
 0x313   :  { %v699_v18 = vadd.f32 %v2248_v12, %v698_v11 }
 0x314   :  { %v2489_v13 = vpop.f32.mrf.mxu0 }
 0x315   :  { %v710_v15 = vadd.f32 %v2489_v13, %v2248_v12 }
 0x316   :  { %v701_v17 = vpop.f32.mrf.mxu0 }
 0x317   :  { %v720_v19 = vpack.c.bf16 %v710_v15, %v707_v14  ;;  %v702_v20 = vadd.f32 %v2248_v12, %v701_v17 }
 0x319   :  { %v719_v22 = vpack.c.bf16 %v702_v20, %v699_v18  ;;  %2490 = vmatprep.subr.bf16.mxu1 %v720_v19 }
 0x31a   :  { %2491 = vmatpush3.bf16.msra.mxu1 %v720_v19 }
 0x31b   :  { %2492 = vmatprep.subr.bf16.mxu1 %v719_v22 }
 0x31e   :  { %2493 = vmatpush3.bf16.msra.mxu1 %v719_v22 }
 0x31f   :  { %2494 = vmatprep.subr.bf16.mxu1 %v718_v24 }
 0x322   :  { %2495 = vmatpush3.bf16.msra.mxu1 %v718_v24 }
 0x323   :  { %2496 = vmatprep.subr.bf16.mxu1 %v717_v28 }
 0x326   :  { %2497 = vmatpush3.bf16.msra.mxu1 %v717_v28  ;;  %v3299_v28 = vld [vmem:[#allocation11 + $0x68] sm:$0xff] }
 0x327   :  { %2498 = vmatprep.subr.bf16.mxu1 %v716_v30 }
 0x32a   :  { %2499 = vmatpush3.bf16.msra.mxu1 %v716_v30  ;;  %v3307_v30 = vld [vmem:[#allocation11 + $0x58] sm:$0xff] }
 0x32b   :  { %2500 = vmatprep.subr.bf16.mxu1 %v715_v34 }
 0x32e   :  { %2501 = vmatpush3.bf16.msra.mxu1 %v715_v34  ;;  %v3323_v34 = vld [vmem:[#allocation11 + $0x38] sm:$0xff] }
 0x32f   :  { %2502 = vmatprep.subr.bf16.mxu1 %v714_v36 }
 0x332   :  { %2503 = vmatpush3.bf16.msra.mxu1 %v714_v36  ;;  %v3331_v36 = vld [vmem:[#allocation11 + $0x28] sm:$0xff] }
 0x333   :  { %2504 = vmatprep.subr.bf16.mxu1 %v713_v39 }
 0x336   :  { %2505 = vmatpush3.bf16.msra.mxu1 %v713_v39 }
 0x339   :  { %2507 = vmatmul.mubr.bf16.vlgmr.msra.gmra.mxu1 %v3260_v63 }
 0x33a   :  { %2510 = vmatprep.mubr.bf16.mxu1 %v3262_v0 }
 0x341   :  { %2511 = vmatmul.mubr.bf16.gmra.mxu1 %v3266_v1 }
 0x342   :  { %2514 = vmatprep.mubr.bf16.mxu1 %v3268_v2 }
 0x349   :  { %2515 = vmatmul.mubr.bf16.gmra.mxu1 %v3272_v3 }
 0x34a   :  { %2518 = vmatprep.mubr.bf16.mxu1 %v3274_v4 }
 0x351   :  { %2519 = vmatmul.mubr.bf16.gmra.mxu1 %v3278_v5 }
 0x352   :  { %2570 = vmatprep.mubr.bf16.mxu1 %v3254_v16 }
 0x3f9   :  { %v2508_v43 = vpop.f32.mrf.mxu1 }
 0x3fa   :  { %v820_v50 = vmax.f32 %v2508_v43, 0.0 }
 0x3fb   :  { %v755_v44 = vpop.f32.mrf.mxu1 }
 0x3fc   :  { %v818_v48 = vmax.f32 %v755_v44, 0.0 }
 0x3fd   :  { %v2509_v45 = vpop.f32.mrf.mxu1 }
 0x3fe   :  { %v821_v46 = vmax.f32 %v2509_v45, 0.0 }
 0x3ff   :  { %v758_v47 = vpop.f32.mrf.mxu1 }
 0x400   :  { %v819_v49 = vmax.f32 %v758_v47, 0.0  ;;  %v835_v16 = vpack.c.bf16 %v821_v46, %v820_v50 }
 0x401   :  { %v2512_v51 = vpop.f32.mrf.mxu1 }
 0x402   :  { %v834_v52 = vpack.c.bf16 %v819_v49, %v818_v48  ;;  %v824_v59 = vmax.f32 %v2512_v51, 0.0 }
 0x403   :  { %v771_v53 = vpop.f32.mrf.mxu1 }
 0x404   :  { %2538 = vmatprep.mubr.bf16.mxu0 %v834_v52  ;;  %v822_v57 = vmax.f32 %v771_v53, 0.0 }
 0x405   :  { %v2513_v54 = vpop.f32.mrf.mxu1  ;;  %2539 = vmatmul.mubr.bf16.vlgmr.msra.gmra.mxu0 %v835_v16  ;;  %v2257_v16 = vld [vmem:[%s4262_s7] ss:$0 sm:$0xff]  ;;  %s3155_s7 = smov [#allocation14]  }
 0x406   :  { %v825_v55 = vmax.f32 %v2513_v54, 0.0  ;;  %2587 = vmatpush3.msra.mxu0 %v3293_v26  ;;  %s2189_s30 = sshll.u32 %s3155_s7, 4  ;;  %s2190_s30 = int_to_ptr.vmem [resolvable:$true] %s2189_s30 }
 0x407   :  { %v774_v56 = vpop.f32.mrf.mxu1  ;;  %2588 = vmatprep.subr.mxu0 %v3295_v27  ;;  %s3073_s1 = scalar_lea.vmem %s2190_s30, 2048  ;;  %p3078_p3 = scmp.lt.s32.totalorder %s2190_s30, %s2190_s30 }
 0x408   :  { %v823_v58 = vmax.f32 %v774_v56, 0.0  ;;  %v837_v62 = vpack.c.bf16 %v825_v55, %v824_v59  ;;  %2589 = vmatpush3.msra.mxu0 %v3295_v27  ;;  %p3074_p2 = scmp.ne.s32.totalorder %s2190_s30, %s3073_s1  ;;  %p3079_p4 = scmp.lt.s32.totalorder %s3073_s1, %s3073_s1 }
 0x409   :  { %v2516_v60 = vpop.f32.mrf.mxu1  ;;  %2590 = vmatprep.subr.mxu0 %v3299_v28 }
 0x40a   :  { %v836_v61 = vpack.c.bf16 %v823_v58, %v822_v57  ;;  %v828_v12 = vmax.f32 %v2516_v60, 0.0  ;;  %2591 = vmatpush3.msra.mxu0 %v3299_v28  ;;  %p3080_p5 = por %p3079_p4, %p3078_p3 }
 0x40b   :  { %v787_v6 = vpop.f32.mrf.mxu1  ;;  %2592 = vmatprep.subr.mxu0 %v3303_v29 }
 0x40c   :  { %2542 = vmatprep.mubr.bf16.mxu0 %v836_v61  ;;  %v826_v10 = vmax.f32 %v787_v6, 0.0  ;;  %2593 = vmatpush3.msra.mxu0 %v3303_v29  ;;  %p3081_p6 = pnand %p3080_p5, %p3074_p2 }
 0x40d   :  { %v2517_v7 = vpop.f32.mrf.mxu1  ;;  %2543 = vmatmul.mubr.bf16.gmra.mxu0 %v837_v62  ;;  %2594 = vmatprep.subr.mxu0 %v3307_v30 }
 0x40e   :  { %v829_v8 = vmax.f32 %v2517_v7, 0.0  ;;  %2595 = vmatpush3.msra.mxu0 %v3307_v30 }
 0x40f   :  { %v790_v9 = vpop.f32.mrf.mxu1  ;;  %2596 = vmatprep.subr.mxu0 %v3311_v31 }
 0x410   :  { %v827_v11 = vmax.f32 %v790_v9, 0.0  ;;  %v839_v15 = vpack.c.bf16 %v829_v8, %v828_v12  ;;  %2597 = vmatpush3.msra.mxu0 %v3311_v31 }
 0x411   :  { %v2520_v13 = vpop.f32.mrf.mxu1  ;;  %2598 = vmatprep.subr.mxu0 %v3315_v32 }
 0x412   :  { %v838_v14 = vpack.c.bf16 %v827_v11, %v826_v10  ;;  %v832_v23 = vmax.f32 %v2520_v13, 0.0  ;;  %2599 = vmatpush3.msra.mxu0 %v3315_v32 }
 0x413   :  { %v803_v17 = vpop.f32.mrf.mxu1  ;;  %2600 = vmatprep.subr.mxu0 %v3319_v33 }
 0x414   :  { %2546 = vmatprep.mubr.bf16.mxu0 %v838_v14  ;;  %v830_v21 = vmax.f32 %v803_v17, 0.0  ;;  %2601 = vmatpush3.msra.mxu0 %v3319_v33 }
 0x415   :  { %v2521_v18 = vpop.f32.mrf.mxu1  ;;  %2547 = vmatmul.mubr.bf16.gmra.mxu0 %v839_v15  ;;  %2602 = vmatprep.subr.mxu0 %v3323_v34 }
 0x416   :  { %v833_v19 = vmax.f32 %v2521_v18, 0.0  ;;  %2603 = vmatpush3.msra.mxu0 %v3323_v34 }
 0x417   :  { %v806_v20 = vpop.f32.mrf.mxu1  ;;  %2604 = vmatprep.subr.mxu0 %v3327_v35 }
 0x418   :  { %v831_v22 = vmax.f32 %v806_v20, 0.0  ;;  %v841_v25 = vpack.c.bf16 %v833_v19, %v832_v23  ;;  %2605 = vmatpush3.msra.mxu0 %v3327_v35 }
 0x419   :  { %2606 = vmatprep.subr.mxu0 %v3331_v36 }
 0x41a   :  { %v840_v24 = vpack.c.bf16 %v831_v22, %v830_v21  ;;  %2607 = vmatpush3.msra.mxu0 %v3331_v36 }
 0x41b   :  { %2608 = vmatprep.subr.mxu0 %v3335_v37 }
 0x41c   :  { %2550 = vmatprep.mubr.bf16.mxu0 %v840_v24  ;;  %2609 = vmatpush3.msra.mxu0 %v3335_v37 }
 0x41d   :  { %2551 = vmatmul.mubr.bf16.gmra.mxu0 %v841_v25  ;;  %2610 = vmatprep.subr.mxu0 %v3339_v38 }
 0x41e   :  { %2611 = vmatpush3.msra.mxu0 %v3339_v38 }
 0x4c5   :  { %v2540_v39 = vpop.f32.mrf.mxu0 }
 0x4c6   :  { %v956_v18 = vadd.f32 %v2540_v39, %v2257_v16 }
 0x4c7   :  { %v947_v40 = vpop.f32.mrf.mxu0 }
 0x4c8   :  { %v948_v21 = vadd.f32 %v2257_v16, %v947_v40 }
 0x4c9   :  { %v2541_v41 = vpop.f32.mrf.mxu0 }
 0x4ca   :  { %v959_v15 = vadd.f32 %v2541_v41, %v2257_v16 }
 0x4cb   :  { %v950_v42 = vpop.f32.mrf.mxu0 }
 0x4cc   :  { %v1011_v19 = vpack.c.bf16 %v959_v15, %v956_v18  ;;  %v951_v20 = vadd.f32 %v2257_v16, %v950_v42 }
 0x4cd   :  { %v2544_v43 = vpop.f32.mrf.mxu0 }
 0x4ce   :  { %v972_v11 = vadd.f32 %v2544_v43, %v2257_v16  ;;  %v1010_v22 = vpack.c.bf16 %v951_v20, %v948_v21 }
 0x4cf   :  { %v963_v44 = vpop.f32.mrf.mxu0 }
 0x4d0   :  { %v964_v14 = vadd.f32 %v2257_v16, %v963_v44 }
 0x4d1   :  { %v2545_v45 = vpop.f32.mrf.mxu0 }
 0x4d2   :  { %v975_v9 = vadd.f32 %v2545_v45, %v2257_v16 }
 0x4d3   :  { %v966_v46 = vpop.f32.mrf.mxu0 }
 0x4d4   :  { %v1013_v12 = vpack.c.bf16 %v975_v9, %v972_v11  ;;  %v967_v13 = vadd.f32 %v2257_v16, %v966_v46  ;;  %v1343_v11 = vmul.f32 %v3339_v38, %v3339_v38 }
 0x4d5   :  { %v2548_v47 = vpop.f32.mrf.mxu0 }
 0x4d6   :  { %v988_v62 = vadd.f32 %v2548_v47, %v2257_v16  ;;  %v1012_v17 = vpack.c.bf16 %v967_v13, %v964_v14  ;;  %v1345_v14 = vmul.f32 %v3331_v36, %v3331_v36 }
 0x4d7   :  { %v979_v48 = vpop.f32.mrf.mxu0 }
 0x4d8   :  { %v980_v8 = vadd.f32 %v2257_v16, %v979_v48 }
 0x4d9   :  { %v2549_v49 = vpop.f32.mrf.mxu0 }
 0x4da   :  { %v991_v60 = vadd.f32 %v2549_v49, %v2257_v16 }
 0x4db   :  { %v982_v50 = vpop.f32.mrf.mxu0 }
 0x4dc   :  { %v1015_v6 = vpack.c.bf16 %v991_v60, %v988_v62  ;;  %v983_v7 = vadd.f32 %v2257_v16, %v982_v50 }
 0x4dd   :  { %v2552_v51 = vpop.f32.mrf.mxu0 }
 0x4de   :  { %v1004_v54 = vadd.f32 %v2552_v51, %v2257_v16  ;;  %v1014_v10 = vpack.c.bf16 %v983_v7, %v980_v8 }
 0x4df   :  { %v995_v52 = vpop.f32.mrf.mxu0 }
 0x4e0   :  { %v996_v57 = vadd.f32 %v2257_v16, %v995_v52 }
 0x4e1   :  { %v2553_v53 = vpop.f32.mrf.mxu0 }
 0x4e2   :  { %v1007_v55 = vadd.f32 %v2553_v53, %v2257_v16 }
 0x4e3   :  { %v998_v56 = vpop.f32.mrf.mxu0 }
 0x4e4   :  { %v1017_v58 = vpack.c.bf16 %v1007_v55, %v1004_v54  ;;  %v999_v59 = vadd.f32 %v2257_v16, %v998_v56 }
 0x4e6   :  { %v1016_v61 = vpack.c.bf16 %v999_v59, %v996_v57  ;;  %2554 = vmatprep.subr.bf16.mxu1 %v1017_v58 }
 0x4e7   :  { %2555 = vmatpush3.bf16.msra.mxu1 %v1017_v58 }
 0x4e8   :  { %2556 = vmatprep.subr.bf16.mxu1 %v1016_v61 }
 0x4eb   :  { %2557 = vmatpush3.bf16.msra.mxu1 %v1016_v61 }
 0x4ec   :  { %2558 = vmatprep.subr.bf16.mxu1 %v1015_v6 }
 0x4ef   :  { %2559 = vmatpush3.bf16.msra.mxu1 %v1015_v6 }
 0x4f0   :  { %2560 = vmatprep.subr.bf16.mxu1 %v1014_v10 }
 0x4f3   :  { %2561 = vmatpush3.bf16.msra.mxu1 %v1014_v10 }
 0x4f4   :  { %2562 = vmatprep.subr.bf16.mxu1 %v1013_v12 }
 0x4f7   :  { %2563 = vmatpush3.bf16.msra.mxu1 %v1013_v12  ;;  %v1344_v12 = vmul.f32 %v3335_v37, %v3335_v37 }
 0x4f8   :  { %2564 = vmatprep.subr.bf16.mxu1 %v1012_v17 }
 0x4fb   :  { %2565 = vmatpush3.bf16.msra.mxu1 %v1012_v17  ;;  %v1346_v17 = vmul.f32 %v3327_v35, %v3327_v35 }
 0x4fc   :  { %2566 = vmatprep.subr.bf16.mxu1 %v1011_v19 }
 0x4ff   :  { %2567 = vmatpush3.bf16.msra.mxu1 %v1011_v19  ;;  %v1347_v19 = vmul.f32 %v3323_v34, %v3323_v34 }
 0x500   :  { %2568 = vmatprep.subr.bf16.mxu1 %v1010_v22 }
 0x503   :  { %2569 = vmatpush3.bf16.msra.mxu1 %v1010_v22 }
 0x504   :  { %2642 = vmatprep.subr.mxu1 %v3293_v26 }
 0x506   :  { %2571 = vmatmul.mubr.bf16.vlgmr.msra.gmra.mxu1 %v3260_v63  ;;  %v1133_v63 = vld [vmem:[#allocation11 + $0x10] sm:$0xff] }
 0x507   :  { %2574 = vmatprep.mubr.bf16.mxu1 %v3262_v0  ;;  %2658 = vmatpush3.msra.mxu1 %v3293_v26  ;;  %v1131_v0 = vld [vmem:[#allocation11] sm:$0xff] }
 0x508   :  { %2643 = vmatprep.subr.mxu1 %v3295_v27  ;;  %2612 = vmatprep.subr.mxu0 %v1133_v63 }
 0x509   :  { %2659 = vmatpush3.msra.mxu1 %v3295_v27  ;;  %2613 = vmatpush3.msra.mxu0 %v1133_v63 }
 0x50a   :  { %2644 = vmatprep.subr.mxu1 %v3299_v28 }
 0x50b   :  { %2660 = vmatpush3.msra.mxu1 %v3299_v28 }
 0x50c   :  { %2645 = vmatprep.subr.mxu1 %v3303_v29 }
 0x50d   :  { %2661 = vmatpush3.msra.mxu1 %v3303_v29 }
 0x50e   :  { %2575 = vmatmul.mubr.bf16.gmra.mxu1 %v3266_v1  ;;  %2646 = vmatprep.subr.mxu1 %v3307_v30  ;;  %v1132_v1 = vld [vmem:[#allocation11 + $0x8] sm:$0xff] }
 0x50f   :  { %2578 = vmatprep.mubr.bf16.mxu1 %v3268_v2  ;;  %2662 = vmatpush3.msra.mxu1 %v3307_v30  ;;  %v1340_v2 = vmul.f32 %v1131_v0, %v1131_v0 }
 0x510   :  { %2647 = vmatprep.subr.mxu1 %v3311_v31  ;;  %2614 = vmatprep.subr.mxu0 %v1132_v1 }
 0x511   :  { %2663 = vmatpush3.msra.mxu1 %v3311_v31  ;;  %2615 = vmatpush3.msra.mxu0 %v1132_v1 }
 0x512   :  { %2648 = vmatprep.subr.mxu1 %v3315_v32  ;;  %2616 = vmatprep.subr.mxu0 %v1131_v0 }
 0x513   :  { %2664 = vmatpush3.msra.mxu1 %v3315_v32  ;;  %2617 = vmatpush3.msra.mxu0 %v1131_v0 }
 0x514   :  { %2649 = vmatprep.subr.mxu1 %v3319_v33 }
 0x515   :  { %2665 = vmatpush3.msra.mxu1 %v3319_v33 }
 0x516   :  { %2579 = vmatmul.mubr.bf16.gmra.mxu1 %v3272_v3  ;;  %2650 = vmatprep.subr.mxu1 %v3323_v34  ;;  %v1341_v3 = vmul.f32 %v1132_v1, %v1132_v1 }
 0x517   :  { %2582 = vmatprep.mubr.bf16.mxu1 %v3274_v4  ;;  %2666 = vmatpush3.msra.mxu1 %v3323_v34  ;;  %v1342_v4 = vmul.f32 %v1133_v63, %v1133_v63  ;;  %v1352_v34 = vmul.f32 %v3303_v29, %v3303_v29 }
 0x518   :  { %2651 = vmatprep.subr.mxu1 %v3327_v35  ;;  %v1356_v23 = vadd.f32 %v1341_v3, %v1340_v2 }
 0x519   :  { %2667 = vmatpush3.msra.mxu1 %v3327_v35  ;;  %v1351_v35 = vmul.f32 %v3307_v30, %v3307_v30 }
 0x51a   :  { %2652 = vmatprep.subr.mxu1 %v3331_v36 }
 0x51b   :  { %2668 = vmatpush3.msra.mxu1 %v3331_v36  ;;  %v1350_v36 = vmul.f32 %v3311_v31, %v3311_v31  ;;  %v1355_v31 = vmul.f32 %v3293_v26, %v3293_v26 }
 0x51c   :  { %2653 = vmatprep.subr.mxu1 %v3335_v37 }
 0x51d   :  { %2669 = vmatpush3.msra.mxu1 %v3335_v37  ;;  %v1349_v37 = vmul.f32 %v3315_v32, %v3315_v32  ;;  %v1354_v32 = vmul.f32 %v3295_v27, %v3295_v27 }
 0x51e   :  { %2583 = vmatmul.mubr.bf16.gmra.mxu1 %v3278_v5  ;;  %2654 = vmatprep.subr.mxu1 %v3339_v38  ;;  %v3381_v5 = vadd.f32 %v1356_v23, %v1342_v4 }
 0x51f   :  { %2670 = vmatpush3.msra.mxu1 %v3339_v38  ;;  %v1348_v38 = vmul.f32 %v3319_v33, %v3319_v33  ;;  %v1353_v33 = vmul.f32 %v3299_v28, %v3299_v28 }
 0x520   :  { %2655 = vmatprep.subr.mxu1 %v1133_v63  ;;  %v1358_v13 = vadd.f32 %v3381_v5, %v1343_v11 }
 0x521   :  { %2671 = vmatpush3.msra.mxu1 %v1133_v63 }
 0x522   :  { %2656 = vmatprep.subr.mxu1 %v1132_v1  ;;  %v1359_v15 = vadd.f32 %v1358_v13, %v1344_v12 }
 0x523   :  { %2672 = vmatpush3.msra.mxu1 %v1132_v1 }
 0x524   :  { %2657 = vmatprep.subr.mxu1 %v1131_v0  ;;  %v1360_v18 = vadd.f32 %v1359_v15, %v1345_v14 }
 0x525   :  { %2673 = vmatpush3.msra.mxu1 %v1131_v0 }
 0x526   :  { %v1361_v20 = vadd.f32 %v1360_v18, %v1346_v17 }
 0x528   :  { %v1362_v21 = vadd.f32 %v1361_v20, %v1347_v19 }
 0x52a   :  { %v1363_v22 = vadd.f32 %v1362_v21, %v1348_v38 }
 0x52c   :  { %v1364_v63 = vadd.f32 %v1363_v22, %v1349_v37 }
 0x52e   :  { %v1365_v0 = vadd.f32 %v1364_v63, %v1350_v36 }
 0x530   :  { %v1366_v1 = vadd.f32 %v1365_v0, %v1351_v35 }
 0x532   :  { %v1367_v2 = vadd.f32 %v1366_v1, %v1352_v34 }
 0x534   :  { %v1368_v3 = vadd.f32 %v1367_v2, %v1353_v33 }
 0x536   :  { %v1369_v4 = vadd.f32 %v1368_v3, %v1354_v32 }
 0x538   :  { %v1370_v23 = vadd.f32 %v1369_v4, %v1355_v31 }
 0x53a   :  { %v1371_v5 = vrot.slane %v1370_v23, 4 }
 0x53c   :  { %v1372_v30 = vadd.f32 %v1371_v5, %v1370_v23 }
 0x5c6   :  { %v2572_v24 = vpop.f32.mrf.mxu1 }
 0x5c7   :  { %1117 = vst [vmem:[#allocation14 + $0x10] sm:$0xff] %v2572_v24  ;;  %v1294_v25 = vmul.f32 %v2572_v24, %v2572_v24 }
 0x5c8   :  { %v1052_v39 = vpop.f32.mrf.mxu1 }
 0x5c9   :  { %1115 = vst [vmem:[#allocation14] sm:$0xff] %v1052_v39  ;;  %1312 = vadd.xlane.f32.xlu1 %v1294_v25  ;;  %2618 = vmatprep.mubr.f32.mxu0 %v1052_v39  ;;  %v1292_v40 = vmul.f32 %v1052_v39, %v1052_v39 }
 0x5ca   :  { %v2573_v41 = vpop.f32.mrf.mxu1 }
 0x5cb   :  { %1118 = vst [vmem:[#allocation14 + $0x18] sm:$0xff] %v2573_v41  ;;  %1308 = vadd.xlane.f32.xlu0 %v1292_v40  ;;  %v1295_v42 = vmul.f32 %v2573_v41, %v2573_v41 }
 0x5cc   :  { %v1055_v43 = vpop.f32.mrf.mxu1 }
 0x5cd   :  { %1116 = vst [vmem:[#allocation14 + $0x8] sm:$0xff] %v1055_v43  ;;  %1314 = vadd.xlane.f32.xlu1 %v1295_v42  ;;  %2619 = vmatmul.mubr.f32.vlgmr.msra.gmra.mxu0 %v1055_v43  ;;  %v1293_v44 = vmul.f32 %v1055_v43, %v1055_v43 }
 0x5ce   :  { %v2576_v45 = vpop.f32.mrf.mxu1  ;;  %2621 = vmatprep.mubr.f32.mxu0 %v2572_v24  ;;  %v1373_v24 = vrot.slane %v1372_v30, 2 }
 0x5cf   :  { %1121 = vst [vmem:[#allocation14 + $0x30] sm:$0xff] %v2576_v45  ;;  %1310 = vadd.xlane.f32.xlu0 %v1293_v44  ;;  %v1298_v47 = vmul.f32 %v2576_v45, %v2576_v45 }
 0x5d0   :  { %v1068_v46 = vpop.f32.mrf.mxu1  ;;  %v1374_v25 = vadd.f32 %v1373_v24, %v1372_v30 }
 0x5d1   :  { %1119 = vst [vmem:[#allocation14 + $0x20] sm:$0xff] %v1068_v46  ;;  %2622 = vmatmul.mubr.f32.gmra.mxu0 %v2573_v41  ;;  %v1296_v51 = vmul.f32 %v1068_v46, %v1068_v46 }
 0x5d2   :  { %v2577_v48 = vpop.f32.mrf.mxu1  ;;  %2624 = vmatprep.mubr.f32.mxu0 %v1068_v46  ;;  %v1375_v39 = vrot.slane %v1374_v25, 1 }
 0x5d3   :  { %1122 = vst [vmem:[#allocation14 + $0x38] sm:$0xff] %v2577_v48  ;;  %1320 = vadd.xlane.f32.xlu0 %v1298_v47  ;;  %v1299_v49 = vmul.f32 %v2577_v48, %v2577_v48 }
 0x5d4   :  { %v1071_v50 = vpop.f32.mrf.mxu1  ;;  %v3410_v29 = vadd.f32 %v1375_v39, %v1374_v25 }
 0x5d5   :  { %1120 = vst [vmem:[#allocation14 + $0x28] sm:$0xff] %v1071_v50  ;;  %1322 = vadd.xlane.f32.xlu1 %v1299_v49  ;;  %2625 = vmatmul.mubr.f32.gmra.mxu0 %v1071_v50  ;;  %v1297_v16 = vmul.f32 %v1071_v50, %v1071_v50 }
 0x5d6   :  { %v2580_v52 = vpop.f32.mrf.mxu1  ;;  %2627 = vmatprep.mubr.f32.mxu0 %v2576_v45  ;;  %2727 = vrsqrt.f32 %v3410_v29  ;;  %vm1379_vm0 = vcmp.eq.f32.partialorder %v3410_v29, inf  ;;  %vm1381_vm1 = vcmp.eq.f32.partialorder %v3410_v29, 0.0 }
 0x5d7   :  { %1125 = vst [vmem:[#allocation14 + $0x50] sm:$0xff] %v2580_v52  ;;  %1316 = vadd.xlane.f32.xlu0 %v1296_v51  ;;  %v1302_v54 = vmul.f32 %v2580_v52, %v2580_v52 }
 0x5d8   :  { %v1084_v53 = vpop.f32.mrf.mxu1 }
 0x5d9   :  { %1123 = vst [vmem:[#allocation14 + $0x40] sm:$0xff] %v1084_v53  ;;  %1318 = vadd.xlane.f32.xlu1 %v1297_v16  ;;  %2628 = vmatmul.mubr.f32.gmra.mxu0 %v2577_v48  ;;  %v1300_v58 = vmul.f32 %v1084_v53, %v1084_v53  ;;  %v1382_v48 = vand.u32 2147483648, %v3410_v29  ;;  %v1753_v16 = vlaneseq }
 0x5da   :  { %2630 = vmatprep.mubr.f32.mxu1 %v1084_v53  ;;  %v2581_v55 = vpop.f32.mrf.mxu1 }
 0x5db   :  { %1126 = vst [vmem:[#allocation14 + $0x58] sm:$0xff] %v2581_v55  ;;  %1328 = vadd.xlane.f32.xlu0 %v1302_v54  ;;  %v1303_v56 = vmul.f32 %v2581_v55, %v2581_v55 }
 0x5dc   :  { %v1087_v57 = vpop.f32.mrf.mxu1 }
 0x5dd   :  { %1124 = vst [vmem:[#allocation14 + $0x48] sm:$0xff] %v1087_v57  ;;  %1330 = vadd.xlane.f32.xlu1 %v1303_v56  ;;  %2631 = vmatmul.mubr.f32.vlgmr.msra.gmra.mxu1 %v1087_v57  ;;  %v1301_v60 = vmul.f32 %v1087_v57, %v1087_v57 }
 0x5de   :  { %v2584_v59 = vpop.f32.mrf.mxu1  ;;  %2633 = vmatprep.mubr.f32.mxu1 %v2580_v52 }
 0x5df   :  { %1129 = vst [vmem:[#allocation14 + $0x70] sm:$0xff] %v2584_v59  ;;  %1324 = vadd.xlane.f32.xlu0 %v1300_v58  ;;  %v1306_v8 = vmul.f32 %v2584_v59, %v2584_v59 }
 0x5e0   :  { %v1100_v61 = vpop.f32.mrf.mxu1 }
 0x5e1   :  { %1127 = vst [vmem:[#allocation14 + $0x60] sm:$0xff] %v1100_v61  ;;  %1326 = vadd.xlane.f32.xlu1 %v1301_v60  ;;  %2634 = vmatmul.mubr.f32.gmra.mxu1 %v2581_v55  ;;  %v1304_v62 = vmul.f32 %v1100_v61, %v1100_v61 }
 0x5e2   :  { %v2585_v6 = vpop.f32.mrf.mxu1  ;;  %2636 = vmatprep.mubr.f32.mxu1 %v1100_v61 }
 0x5e3   :  { %1130 = vst [vmem:[#allocation14 + $0x78] sm:$0xff] %v2585_v6  ;;  %1332 = vadd.xlane.f32.xlu0 %v1304_v62  ;;  %v1307_v10 = vmul.f32 %v2585_v6, %v2585_v6  ;;  %v2728_v42 = vpop.eup %2727 }
 0x5e4   :  { %v1103_v7 = vpop.f32.mrf.mxu1  ;;  %v1378_v45 = vmul.f32 %v2728_v42, %v3410_v29 }
 0x5e5   :  { %1128 = vst [vmem:[#allocation14 + $0x68] sm:$0xff] %v1103_v7  ;;  %2637 = vmatmul.mubr.f32.gmra.mxu1 %v1103_v7  ;;  %v1305_v9 = vmul.f32 %v1103_v7, %v1103_v7 }
 0x5e6   :  { %2639 = vmatprep.mubr.f32.mxu1 %v2584_v59  ;;  %v1380_v49 = vsel %vm1379_vm0, %v3410_v29, %v1378_v45  ;;  %v3456_v59 = vand.u32 127, %v1753_v16 }
 0x5e7   :  { %1336 = vadd.xlane.f32.xlu0 %v1306_v8  ;;  %1334 = vadd.xlane.f32.xlu1 %v1305_v9  ;;  %v1383_v52 = vsel %vm1381_vm1, %v1382_v48, %v1380_v49 }
 0x5e8   :  { %v3449_v56 = vmax.f32 %v1383_v52, 1e-06 }
 0x5e9   :  { %2640 = vmatmul.mubr.f32.gmra.mxu1 %v2585_v6 }
 0x5eb   :  { %1338 = vadd.xlane.f32.xlu1 %v1307_v10 }
 0x652   :  { %v3413_v28 = vpop.xlane.xlu1 %1312 }
 0x653   :  { %vm1400_vm2 = vcmp.eq.f32.partialorder %v3413_v28, inf  ;;  %vm1402_vm3 = vcmp.eq.f32.partialorder %v3413_v28, 0.0  ;;  %v1403_v62 = vand.u32 2147483648, %v3413_v28  ;;  %v3469_v8 = vadd.f32 %v3410_v29, %v3413_v28 }
 0x654   :  { %v3415_v40 = vpop.xlane.xlu0 %1308 }
 0x655   :  { %2729 = vrsqrt.f32 %v3415_v40  ;;  %vm1386_vm4 = vcmp.eq.f32.partialorder %v3415_v40, inf  ;;  %vm1388_vm5 = vcmp.eq.f32.partialorder %v3415_v40, 0.0  ;;  %v1389_v9 = vand.u32 2147483648, %v3415_v40 }
 0x656   :  { %v3419_v41 = vpop.xlane.xlu1 %1314  ;;  %2731 = vrsqrt.f32 %v3413_v28  ;;  %v3476_v10 = vadd.f32 %v3410_v29, %v3415_v40 }
 0x657   :  { %vm1407_vm6 = vcmp.eq.f32.partialorder %v3419_v41, inf  ;;  %vm1409_vm7 = vcmp.eq.f32.partialorder %v3419_v41, 0.0  ;;  %v1410_v13 = vand.u32 2147483648, %v3419_v41  ;;  %v3491_v17 = vadd.f32 %v3410_v29, %v3419_v41 }
 0x658   :  { %v3417_v27 = vpop.xlane.xlu0 %1310 }
 0x659   :  { %2733 = vrsqrt.f32 %v3417_v27  ;;  %vm1393_vm8 = vcmp.eq.f32.partialorder %v3417_v27, inf  ;;  %vm1395_vm9 = vcmp.eq.f32.partialorder %v3417_v27, 0.0  ;;  %v1396_v19 = vand.u32 2147483648, %v3417_v27 }
 0x65a   :  { %2735 = vrsqrt.f32 %v3419_v41  ;;  %v3498_v20 = vadd.f32 %v3410_v29, %v3417_v27 }
 0x65c   :  { %v3422_v26 = vpop.xlane.xlu0 %1320 }
 0x65d   :  { %v1431_v21 = vand.u32 2147483648, %v3422_v26  ;;  %v3508_v36 = vadd.f32 %v3410_v29, %v3422_v26  ;;  %vm1428_vm10 = vcmp.eq.f32.partialorder %v3422_v26, inf  ;;  %vm1430_vm0 = vcmp.eq.f32.partialorder %v3422_v26, 0.0 }
 0x65e   :  { %v3426_v43 = vpop.xlane.xlu1 %1322 }
 0x65f   :  { %v1438_v37 = vand.u32 2147483648, %v3426_v43  ;;  %v3521_v34 = vadd.f32 %v3410_v29, %v3426_v43  ;;  %vm1435_vm12 = vcmp.eq.f32.partialorder %v3426_v43, inf  ;;  %vm1437_vm1 = vcmp.eq.f32.partialorder %v3426_v43, 0.0 }
 0x660   :  { %v3429_v44 = vpop.xlane.xlu0 %1316 }
 0x661   :  { %vm1414_vm11 = vcmp.eq.f32.partialorder %v3429_v44, inf  ;;  %v1417_v2 = vand.u32 2147483648, %v3429_v44  ;;  %v3530_v3 = vadd.f32 %v3410_v29, %v3429_v44  ;;  %vm1416_vm14 = vcmp.eq.f32.partialorder %v3429_v44, 0.0 }
 0x662   :  { %v3432_v46 = vpop.xlane.xlu1 %1318  ;;  %v2730_v53 = vpop.eup %2729 }
 0x663   :  { %2737 = vrsqrt.f32 %v3432_v46  ;;  %v2732_v54 = vpop.eup %2731  ;;  %v1385_v57 = vmul.f32 %v2730_v53, %v3415_v40  ;;  %vm1421_vm13 = vcmp.eq.f32.partialorder %v3432_v46, inf  ;;  %vm1423_vm15 = vcmp.eq.f32.partialorder %v3432_v46, 0.0 }
 0x664   :  { %v3435_v47 = vpop.xlane.xlu0 %1328  ;;  %2739 = vrsqrt.f32 %v3429_v44  ;;  %v1399_v61 = vmul.f32 %v2732_v54, %v3413_v28  ;;  %v1424_v23 = vand.u32 2147483648, %v3432_v46 }
 0x665   :  { %2741 = vrsqrt.f32 %v3422_v26  ;;  %v1387_v11 = vsel %vm1386_vm4, %v3415_v40, %v1385_v57  ;;  %v1459_v42 = vand.u32 2147483648, %v3435_v47 }
 0x666   :  { %v3440_v50 = vpop.xlane.xlu1 %1330  ;;  %2743 = vrsqrt.f32 %v3426_v43  ;;  %v2734_v55 = vpop.eup %2733  ;;  %v1401_v15 = vsel %vm1400_vm2, %v3413_v28, %v1399_v61  ;;  %v1390_v38 = vsel %vm1388_vm5, %v1389_v9, %v1387_v11  ;;  %vm1456_vm2 = vcmp.eq.f32.partialorder %v3435_v47, inf }
 0x667   :  { %2745 = vrsqrt.f32 %v3440_v50  ;;  %v2736_v60 = vpop.eup %2735  ;;  %v1392_v7 = vmul.f32 %v2734_v55, %v3417_v27  ;;  %v3512_v35 = vsel %vm1402_vm3, %v1403_v62, %v1401_v15  ;;  %v1688_v4 = vmax.f32 %v1390_v38, 1e-06 }
 0x668   :  { %v3444_v51 = vpop.xlane.xlu0 %1324  ;;  %v1406_v12 = vmul.f32 %v2736_v60, %v3419_v41  ;;  %v1690_v30 = vmax.f32 %v3512_v35, 1e-06  ;;  %vm1463_vm3 = vcmp.eq.f32.partialorder %v3440_v50, inf  ;;  %vm1465_vm4 = vcmp.eq.f32.partialorder %v3440_v50, 0.0 }
 0x669   :  { %2747 = vrsqrt.f32 %v3444_v51  ;;  %v1394_v18 = vsel %vm1393_vm8, %v3417_v27, %v1392_v7  ;;  %v1466_v52 = vand.u32 2147483648, %v3440_v50  ;;  %v1705_v16 = vmul.f32 %v3449_v56, %v1688_v4 }
 0x66a   :  { %v3454_v58 = vpop.xlane.xlu1 %1326  ;;  %2749 = vrsqrt.f32 %v3435_v47  ;;  %v1408_v0 = vsel %vm1407_vm6, %v3419_v41, %v1406_v12  ;;  %v1397_v33 = vsel %vm1395_vm9, %v1396_v19, %v1394_v18  ;;  %vm1458_vm5 = vcmp.eq.f32.partialorder %v3435_v47, 0.0 }
 0x66b   :  { %2751 = vrsqrt.f32 %v3454_v58  ;;  %v1411_v24 = vsel %vm1409_vm7, %v1410_v13, %v1408_v0  ;;  %v1689_v28 = vmax.f32 %v1397_v33, 1e-06  ;;  %vm1442_vm6 = vcmp.eq.f32.partialorder %v3444_v51, inf }
 0x66c   :  { %v3462_v6 = vpop.xlane.xlu0 %1332  ;;  %v1691_v48 = vmax.f32 %v1411_v24, 1e-06  ;;  %vm1444_vm7 = vcmp.eq.f32.partialorder %v3444_v51, 0.0  ;;  %v1445_v61 = vand.u32 2147483648, %v3444_v51  ;;  %vm1449_vm8 = vcmp.eq.f32.partialorder %v3454_v58, inf }
 0x66d   :  { %2753 = vrsqrt.f32 %v3462_v6  ;;  %v1706_v62 = vmul.f32 %v3449_v56, %v1689_v28  ;;  %vm1451_vm9 = vcmp.eq.f32.partialorder %v3454_v58, 0.0  ;;  %v1452_v15 = vand.u32 2147483648, %v3454_v58 }
 0x670   :  { %v3482_v14 = vpop.xlane.xlu1 %1334  ;;  %v3504_v22 = vpop.xlane.xlu0 %1336 }
 0x671   :  { %v2738_v63 = vpop.eup %2737  ;;  %2755 = vrsqrt.f32 %v3504_v22 }
 0x672   :  { %v2740_v1 = vpop.eup %2739  ;;  %v1420_v25 = vmul.f32 %v2738_v63, %v3432_v46  ;;  %2757 = vrsqrt.f32 %v3482_v14  ;;  %v1708_v63 = vmul.f32 %v3449_v56, %v1691_v48 }
 0x673   :  { %v2742_v31 = vpop.eup %2741  ;;  %v1413_v40 = vmul.f32 %v2740_v1, %v3429_v44 }
 0x674   :  { %v3526_v32 = vpop.xlane.xlu1 %1338  ;;  %v2744_v5 = vpop.eup %2743  ;;  %v1427_v41 = vmul.f32 %v2742_v31, %v3422_v26  ;;  %v1422_v53 = vsel %vm1421_vm13, %v3432_v46, %v1420_v25  ;;  %v1707_v31 = vmul.f32 %v3449_v56, %v1690_v30  ;;  %vm1486_vm13 = vcmp.eq.f32.partialorder %v3504_v22, 0.0 }
 0x675   :  { %v2746_v39 = vpop.eup %2745  ;;  %2759 = vrsqrt.f32 %v3526_v32  ;;  %v1434_v49 = vmul.f32 %v2744_v5, %v3426_v43  ;;  %v1415_v57 = vsel %vm1414_vm11, %v3429_v44, %v1413_v40  ;;  %v1425_v13 = vsel %vm1423_vm15, %v1424_v23, %v1422_v53 }
 0x676   :  { %v2748_v27 = vpop.eup %2747  ;;  %v1462_v54 = vmul.f32 %v2746_v39, %v3440_v50  ;;  %v1429_v7 = vsel %vm1428_vm10, %v3422_v26, %v1427_v41  ;;  %2761 = vrcp.f32 %v1705_v16  ;;  %v1418_v18 = vsel %vm1416_vm14, %v1417_v2, %v1415_v57 }
 0x677   :  { %v2750_v45 = vpop.eup %2749  ;;  %v1441_v60 = vmul.f32 %v2748_v27, %v3444_v51  ;;  %v1436_v12 = vsel %vm1435_vm12, %v3426_v43, %v1434_v49  ;;  %v1432_v35 = vsel %vm1430_vm0, %v1431_v21, %v1429_v7  ;;  %vm1470_vm10 = vcmp.eq.f32.partialorder %v3462_v6, inf }
 0x678   :  { %v2752_v55 = vpop.eup %2751  ;;  %v1455_v9 = vmul.f32 %v2750_v45, %v3435_v47  ;;  %v1464_v19 = vsel %vm1463_vm3, %v3440_v50, %v1462_v54  ;;  %2763 = vrcp.f32 %v1706_v62  ;;  %v1439_v44 = vsel %vm1437_vm1, %v1438_v37, %v1436_v12 }
 0x679   :  { %v1448_v38 = vmul.f32 %v2752_v55, %v3454_v58  ;;  %v1443_v0 = vsel %vm1442_vm6, %v3444_v51, %v1441_v60  ;;  %v1693_v1 = vmax.f32 %v1425_v13, 1e-06  ;;  %v1692_v21 = vmax.f32 %v1418_v18, 1e-06 }
 0x67a   :  { %v2754_v11 = vpop.eup %2753  ;;  %v1457_v33 = vsel %vm1456_vm2, %v3435_v47, %v1455_v9  ;;  %v1467_v2 = vsel %vm1465_vm4, %v1466_v52, %v1464_v19  ;;  %vm1472_vm11 = vcmp.eq.f32.partialorder %v3462_v6, 0.0  ;;  %v1694_v23 = vmax.f32 %v1432_v35, 1e-06 }
 0x67b   :  { %v1469_v26 = vmul.f32 %v2754_v11, %v3462_v6  ;;  %v1446_v43 = vsel %vm1444_vm7, %v1445_v61, %v1443_v0  ;;  %v1450_v37 = vsel %vm1449_vm8, %v3454_v58, %v1448_v38  ;;  %v1473_v5 = vand.u32 2147483648, %v3462_v6 }
 0x67c   :  { %v1695_v25 = vmax.f32 %v1439_v44, 1e-06  ;;  %v1460_v39 = vsel %vm1458_vm5, %v1459_v42, %v1457_v33  ;;  %vm1484_vm12 = vcmp.eq.f32.partialorder %v3504_v22, inf  ;;  %2765 = vrcp.f32 %v1708_v63 }
 0x67d   :  { %v1699_v28 = vmax.f32 %v1467_v2, 1e-06  ;;  %v1471_v40 = vsel %vm1470_vm10, %v3462_v6, %v1469_v26  ;;  %vm1755_vm14 = vcmp.lt.s32.totalorder %v3456_v59, 8  ;;  %v1710_v27 = vmul.f32 %v3449_v56, %v1693_v1 }
 0x67e   :  { %v2756_v4 = vpop.eup %2755  ;;  %v1696_v41 = vmax.f32 %v1446_v43, 1e-06  ;;  %v1453_v45 = vsel %vm1451_vm9, %v1452_v15, %v1450_v37  ;;  %2767 = vrcp.f32 %v1707_v31  ;;  %v1709_v42 = vmul.f32 %v3449_v56, %v1692_v21 }
 0x67f   :  { %v2758_v24 = vpop.eup %2757  ;;  %v1698_v48 = vmax.f32 %v1460_v39, 1e-06  ;;  %v1483_v49 = vmul.f32 %v2756_v4, %v3504_v22  ;;  %v1487_v52 = vand.u32 2147483648, %v3504_v22  ;;  %v1711_v16 = vmul.f32 %v3449_v56, %v1694_v23 }
 0x680   :  { %v1474_v53 = vsel %vm1472_vm11, %v1473_v5, %v1471_v40  ;;  %v1476_v54 = vmul.f32 %v2758_v24, %v3482_v14  ;;  %v1712_v57 = vmul.f32 %v3449_v56, %v1695_v25  ;;  %v1697_v60 = vmax.f32 %v1453_v45, 1e-06 }
 0x681   :  { %vm1477_vm15 = vcmp.eq.f32.partialorder %v3482_v14, inf  ;;  %2769 = vrcp.f32 %v1710_v27  ;;  %v1716_v61 = vmul.f32 %v3449_v56, %v1699_v28  ;;  %vm1479_vm0 = vcmp.eq.f32.partialorder %v3482_v14, 0.0 }
 0x682   :  { %v2760_v30 = vpop.eup %2759  ;;  %vm1491_vm1 = vcmp.eq.f32.partialorder %v3526_v32, inf  ;;  %2771 = vrcp.f32 %v1709_v42  ;;  %v1713_v62 = vmul.f32 %v3449_v56, %v1696_v41  ;;  %v1700_v9 = vmax.f32 %v1474_v53, 1e-06 }
 0x683   :  { %v1490_v55 = vmul.f32 %v2760_v30, %v3526_v32  ;;  %v2762_v7 = vpop.eup %2761  ;;  %v1485_v11 = vsel %vm1484_vm12, %v3504_v22, %v1483_v49  ;;  %2773 = vrcp.f32 %v1711_v16  ;;  %v1715_v12 = vmul.f32 %v3449_v56, %v1698_v48 }
 0x684   :  { %v1478_v13 = vsel %vm1477_vm15, %v3482_v14, %v1476_v54  ;;  %v1480_v15 = vand.u32 2147483648, %v3482_v14  ;;  %2775 = vrcp.f32 %v1712_v57  ;;  %vm1493_vm2 = vcmp.eq.f32.partialorder %v3526_v32, 0.0 }
 0x685   :  { %v1492_v18 = vsel %vm1491_vm1, %v3526_v32, %v1490_v55  ;;  %v2764_v19 = vpop.eup %2763  ;;  %v1494_v38 = vand.u32 2147483648, %v3526_v32  ;;  %v1714_v35 = vmul.f32 %v3449_v56, %v1697_v60  ;;  %2777 = vrcp.f32 %v1716_v61 }
 0x686   :  { %v1488_v0 = vsel %vm1486_vm13, %v1487_v52, %v1485_v11  ;;  %2779 = vrcp.f32 %v1713_v62  ;;  %v1481_v33 = vsel %vm1479_vm0, %v1480_v15, %v1478_v13  ;;  %v1717_v2 = vmul.f32 %v3449_v56, %v1700_v9 }
 0x687   :  { %v1495_v26 = vsel %vm1493_vm2, %v1494_v38, %v1492_v18  ;;  %2781 = vrcp.f32 %v1715_v12  ;;  %v1702_v5 = vmax.f32 %v1488_v0, 1e-06  ;;  %v1501_v25 = vadd.f32 %v3410_v29, %v3432_v46 }
 0x688   :  { %v3661_v39 = vadd.f32 %v3410_v29, %v3454_v58  ;;  %2783 = vrcp.f32 %v1714_v35  ;;  %v1701_v41 = vmax.f32 %v1481_v33, 1e-06  ;;  %v1703_v45 = vmax.f32 %v1495_v26, 1e-06 }
 0x689   :  { %v2766_v37 = vpop.eup %2765  ;;  %2785 = vrcp.f32 %v1717_v2  ;;  %v3680_v53 = vadd.f32 %v3410_v29, %v3444_v51  ;;  %v1719_v54 = vmul.f32 %v3449_v56, %v1702_v5  ;;  %v3695_v9 = vadd.f32 %v3410_v29, %v3440_v50 }
 0x68a   :  { %v1720_v18 = vmul.f32 %v3449_v56, %v1703_v45  ;;  %v3708_v50 = vadd.f32 %v3410_v29, %v3435_v47 }
 0x68b   :  { %v2768_v27 = vpop.eup %2767 }
 0x68d   :  { %v2620_v63 = vpop.f32.mrf.mxu0 }
 0x68e   :  { %v1513_v44 = vmul.f32 2.0, %v2620_v63  ;;  %2141 = vst [vmem:[#allocation13 + $0x8] sm:$0xff] %v2620_v63  ;;  %v1724_v1 = vmul.f32 %v2764_v19, %v2620_v63  ;;  %v2770_v55 = vpop.eup %2769 }
 0x68f   :  { %v1213_v21 = vpop.f32.mrf.mxu0  ;;  %v2772_v62 = vpop.eup %2771 }
 0x690   :  { %v1529_v31 = vsub.f32 %v3498_v20, %v1513_v44  ;;  %v1512_v4 = vmul.f32 2.0, %v1213_v21  ;;  %2140 = vst [vmem:[#allocation13] sm:$0xff] %v1213_v21  ;;  %v3654_v23 = vsel %vm1755_vm14, %v1724_v1, -1e+30  ;;  %v1722_v43 = vmul.f32 %v2762_v7, %v1213_v21  ;;  %v2774_v11 = vpop.eup %2773 }
 0x691   :  { %v2623_v24 = vpop.f32.mrf.mxu0  ;;  %1950 = vmax.xlane.f32.xlu1 %v3654_v23  ;;  %v2776_v19 = vpop.eup %2775  ;;  %v3719_v1 = vadd.f32 %v3410_v29, %v3482_v14  ;;  %v3730_v14 = vadd.f32 %v3410_v29, %v3526_v32 }
 0x692   :  { %v3663_v20 = vmax.f32 %v1529_v31, 0.0  ;;  %v1528_v30 = vsub.f32 %v3476_v10, %v1512_v4  ;;  %v1515_v28 = vmul.f32 2.0, %v2623_v24  ;;  %2143 = vst [vmem:[#allocation13 + $0x18] sm:$0xff] %v2623_v24  ;;  %v3668_v40 = vsel %vm1755_vm14, %v1722_v43, -1e+30  ;;  %v2778_v0 = vpop.eup %2777 }
 0x693   :  { %v1223_v42 = vpop.f32.mrf.mxu0  ;;  %1948 = vmax.xlane.f32.xlu0 %v3668_v40  ;;  %v1728_v46 = vmul.f32 %v2766_v37, %v2623_v24  ;;  %v2780_v33 = vpop.eup %2779 }
 0x694   :  { %v3671_v58 = vmax.f32 %v1528_v30, 0.0  ;;  %v1531_v48 = vsub.f32 %v3491_v17, %v1515_v28  ;;  %v1514_v49 = vmul.f32 2.0, %v1223_v42  ;;  %2142 = vst [vmem:[#allocation13 + $0x10] sm:$0xff] %v1223_v42  ;;  %v1726_v10 = vmul.f32 %v2768_v27, %v1223_v42  ;;  %v2782_v2 = vpop.eup %2781 }
 0x695   :  { %v2626_v52 = vpop.f32.mrf.mxu0  ;;  %v3676_v16 = vsel %vm1755_vm14, %v1728_v46, -1e+30  ;;  %2787 = vrsqrt.f32 %v3663_v20  ;;  %v2784_v24 = vpop.eup %2783  ;;  %vm1569_vm3 = vcmp.eq.f32.partialorder %v3663_v20, inf  ;;  %vm1571_vm4 = vcmp.eq.f32.partialorder %v3663_v20, 0.0 }
 0x696   :  { %v3684_v57 = vmax.f32 %v1531_v48, 0.0  ;;  %v1530_v17 = vsub.f32 %v3469_v8, %v1514_v49  ;;  %v1517_v60 = vmul.f32 2.0, %v2626_v52  ;;  %2145 = vst [vmem:[#allocation13 + $0x28] sm:$0xff] %v2626_v52  ;;  %1954 = vmax.xlane.f32.xlu1 %v3676_v16  ;;  %v3690_v61 = vsel %vm1755_vm14, %v1726_v10, -1e+30 }
 0x697   :  { %v1233_v51 = vpop.f32.mrf.mxu0  ;;  %1952 = vmax.xlane.f32.xlu0 %v3690_v61  ;;  %v1732_v7 = vmul.f32 %v2770_v55, %v2626_v52  ;;  %2789 = vrsqrt.f32 %v3671_v58  ;;  %v1718_v8 = vmul.f32 %v3449_v56, %v1701_v41  ;;  %vm1562_vm5 = vcmp.eq.f32.partialorder %v3671_v58, inf }
 0x698   :  { %v1533_v12 = vsub.f32 %v1501_v25, %v1517_v60  ;;  %v1516_v13 = vmul.f32 2.0, %v1233_v51  ;;  %2144 = vst [vmem:[#allocation13 + $0x20] sm:$0xff] %v1233_v51  ;;  %v1730_v15 = vmul.f32 %v2772_v62, %v1233_v51  ;;  %v3700_v38 = vmax.f32 %v1530_v17, 0.0 }
 0x699   :  { %v2629_v63 = vpop.f32.mrf.mxu0  ;;  %v3704_v35 = vsel %vm1755_vm14, %v1732_v7, -1e+30  ;;  %2791 = vrsqrt.f32 %v3684_v57  ;;  %vm1564_vm6 = vcmp.eq.f32.partialorder %v3671_v58, 0.0  ;;  %v1565_v52 = vand.u32 2147483648, %v3671_v58 }
 0x69a   :  { %v1532_v44 = vsub.f32 %v3530_v3, %v1516_v13  ;;  %2147 = vst [vmem:[#allocation13 + $0x38] sm:$0xff] %v2629_v63  ;;  %1958 = vmax.xlane.f32.xlu1 %v3704_v35  ;;  %v3715_v56 = vsel %vm1755_vm14, %v1730_v15, -1e+30  ;;  %2793 = vrcp.f32 %v1719_v54  ;;  %v3721_v47 = vmax.f32 %v1533_v12, 0.0 }
 0x69b   :  { %v1243_v26 = vpop.f32.mrf.mxu0  ;;  %1956 = vmax.xlane.f32.xlu0 %v3715_v56  ;;  %v1736_v21 = vmul.f32 %v2776_v19, %v2629_v63  ;;  %v3726_v3 = vadd.f32 %v3410_v29, %v3462_v6  ;;  %2795 = vrcp.f32 %v1718_v8  ;;  %v3740_v6 = vadd.f32 %v3410_v29, %v3504_v22 }
 0x69c   :  { %v1518_v31 = vmul.f32 2.0, %v1243_v26  ;;  %v1734_v4 = vmul.f32 %v2774_v11, %v1243_v26  ;;  %2146 = vst [vmem:[#allocation13 + $0x30] sm:$0xff] %v1243_v26  ;;  %2797 = vrcp.f32 %v1720_v18  ;;  %v3732_v43 = vmax.f32 %v1532_v44, 0.0 }
 0x69d   :  { %v3736_v37 = vsel %vm1755_vm14, %v1736_v21, -1e+30  ;;  %v2632_v5 = vpop.f32.mrf.mxu1  ;;  %2799 = vrsqrt.f32 %v3700_v38  ;;  %v1519_v25 = vmul.f32 2.0, %v2629_v63  ;;  %v1572_v22 = vand.u32 2147483648, %v3663_v20 }
 0x69e   :  { %v1534_v30 = vsub.f32 %v3508_v36, %v1518_v31  ;;  %1962 = vmax.xlane.f32.xlu1 %v3736_v37  ;;  %2149 = vst [vmem:[#allocation13 + $0x48] sm:$0xff] %v2632_v5  ;;  %v3747_v32 = vsel %vm1755_vm14, %v1734_v4, -1e+30  ;;  %v1740_v29 = vmul.f32 %v2784_v24, %v2632_v5  ;;  %2801 = vrsqrt.f32 %v3721_v47  ;;  %v3754_v36 = vpop.eup %2785 }
 0x69f   :  { %1960 = vmax.xlane.f32.xlu0 %v3747_v32  ;;  %v1253_v28 = vpop.f32.mrf.mxu1  ;;  %v1521_v41 = vmul.f32 2.0, %v2632_v5  ;;  %2803 = vrsqrt.f32 %v3732_v43  ;;  %v1535_v10 = vsub.f32 %v3521_v34, %v1519_v25  ;;  %vm1583_vm7 = vcmp.eq.f32.partialorder %v3684_v57, inf }
 0x6a0   :  { %v3756_v27 = vmax.f32 %v1534_v30, 0.0  ;;  %2148 = vst [vmem:[#allocation13 + $0x40] sm:$0xff] %v1253_v28  ;;  %v1738_v45 = vmul.f32 %v2780_v33, %v1253_v28  ;;  %v1520_v42 = vmul.f32 2.0, %v1253_v28  ;;  %v3761_v46 = vsel %vm1755_vm14, %v1740_v29, -1e+30 }
 0x6a1   :  { %v2635_v48 = vpop.f32.mrf.mxu1  ;;  %vm1585_vm8 = vcmp.eq.f32.partialorder %v3684_v57, 0.0  ;;  %v1537_v62 = vsub.f32 %v3661_v39, %v1521_v41  ;;  %v1586_v7 = vand.u32 2147483648, %v3684_v57  ;;  %vm1576_vm9 = vcmp.eq.f32.partialorder %v3700_v38, inf }
 0x6a2   :  { %v2788_v49 = vpop.eup %2787  ;;  %2805 = vrsqrt.f32 %v3756_v27  ;;  %1966 = vmax.xlane.f32.xlu1 %v3761_v46  ;;  %2151 = vst [vmem:[#allocation13 + $0x58] sm:$0xff] %v2635_v48  ;;  %v3772_v54 = vsel %vm1755_vm14, %v1738_v45, -1e+30  ;;  %v1744_v17 = vmul.f32 %v2778_v0, %v2635_v48  ;;  %v1536_v8 = vsub.f32 %v3680_v53, %v1520_v42 }
 0x6a3   :  { %v1263_v55 = vpop.f32.mrf.mxu1  ;;  %v1568_v60 = vmul.f32 %v2788_v49, %v3663_v20  ;;  %1964 = vmax.xlane.f32.xlu0 %v3772_v54  ;;  %vm1578_vm10 = vcmp.eq.f32.partialorder %v3700_v38, 0.0  ;;  %v3790_v18 = vmax.f32 %v1535_v10, 0.0  ;;  %v3792_v19 = vmul.f32 2.0, %v2635_v48 }
 0x6a4   :  { %v2790_v34 = vpop.eup %2789  ;;  %2150 = vst [vmem:[#allocation13 + $0x50] sm:$0xff] %v1263_v55  ;;  %v1742_v51 = vmul.f32 %v2782_v2, %v1263_v55  ;;  %v3783_v11 = vsel %vm1755_vm14, %v1744_v17, -1e+30  ;;  %v1579_v63 = vand.u32 2147483648, %v3700_v38  ;;  %vm1597_vm11 = vcmp.eq.f32.partialorder %v3721_v47, inf }
 0x6a5   :  { %v2638_v12 = vpop.f32.mrf.mxu1  ;;  %v1570_v13 = vsel %vm1569_vm3, %v3663_v20, %v1568_v60  ;;  %v1561_v39 = vmul.f32 %v2790_v34, %v3671_v58  ;;  %v3809_v31 = vmax.f32 %v1537_v62, 0.0  ;;  %vm1599_vm12 = vcmp.eq.f32.partialorder %v3721_v47, 0.0 }
 0x6a6   :  { %v2792_v15 = vpop.eup %2791  ;;  %1970 = vmax.xlane.f32.xlu1 %v3783_v11  ;;  %2153 = vst [vmem:[#allocation13 + $0x68] sm:$0xff] %v2638_v12  ;;  %v3797_v53 = vsel %vm1755_vm14, %v1742_v51, -1e+30  ;;  %v1573_v33 = vsel %vm1571_vm4, %v1572_v22, %v1570_v13  ;;  %v1600_v20 = vand.u32 2147483648, %v3721_v47  ;;  %v3816_v24 = vmax.f32 %v1536_v8, 0.0 }
 0x6a7   :  { %v3800_v0 = vpop.eup %2793  ;;  %v1273_v44 = vpop.f32.mrf.mxu1  ;;  %v1563_v26 = vsel %vm1562_vm5, %v3671_v58, %v1561_v39  ;;  %v1582_v21 = vmul.f32 %v2792_v15, %v3684_v57  ;;  %1968 = vmax.xlane.f32.xlu0 %v3797_v53  ;;  %v1673_v4 = vsub.f32 0.0, %v1573_v33  ;;  %vm1590_vm13 = vcmp.eq.f32.partialorder %v3732_v43, inf }
 0x6a8   :  { %v2796_v2 = vpop.eup %2795  ;;  %2152 = vst [vmem:[#allocation13 + $0x60] sm:$0xff] %v1273_v44  ;;  %v1566_v30 = vsel %vm1564_vm6, %v1565_v52, %v1563_v26  ;;  %v1539_v22 = vsub.f32 %v3695_v9, %v3792_v19  ;;  %v1522_v41 = vmul.f32 2.0, %v1263_v55  ;;  %v1525_v58 = vmul.f32 2.0, %v2638_v12 }
 0x6a9   :  { %v3814_v5 = vpop.eup %2797  ;;  %v3818_v25 = vpop.f32.mrf.mxu1  ;;  %v1584_v28 = vsel %vm1583_vm7, %v3684_v57, %v1582_v21  ;;  %v3830_v45 = vsel %vm1755_vm14, %v1673_v4, -1e+30  ;;  %v1748_v42 = vmul.f32 %v2796_v2, %v2638_v12  ;;  %v1672_v48 = vsub.f32 0.0, %v1566_v30 }
 0x6aa   :  { %v2800_v29 = vpop.eup %2799  ;;  %2155 = vst [vmem:[#allocation13 + $0x78] sm:$0xff] %v3818_v25  ;;  %1790 = vmax.xlane.f32.xlu1 %v3830_v45  ;;  %v1587_v10 = vsel %vm1585_vm8, %v1586_v7, %v1584_v28  ;;  %v1524_v9 = vmul.f32 2.0, %v1273_v44  ;;  %v1746_v60 = vmul.f32 %v3754_v36, %v1273_v44  ;;  %vm1592_vm15 = vcmp.eq.f32.partialorder %v3732_v43, 0.0 }
 0x6ab   :  { %v1283_v49 = vpop.f32.mrf.mxu1  ;;  %v1575_v52 = vmul.f32 %v2800_v29, %v3700_v38  ;;  %v2802_v17 = vpop.eup %2801  ;;  %v3841_v34 = vsel %vm1755_vm14, %v1672_v48, -1e+30  ;;  %v1675_v62 = vsub.f32 0.0, %v1587_v10  ;;  %v1538_v8 = vsub.f32 %v3708_v50, %v1522_v41 }
 0x6ac   :  { %v1526_v55 = vmul.f32 2.0, %v1283_v49  ;;  %2154 = vst [vmem:[#allocation13 + $0x70] sm:$0xff] %v1283_v49  ;;  %v1596_v51 = vmul.f32 %v2802_v17, %v3721_v47  ;;  %v2804_v7 = vpop.eup %2803  ;;  %1788 = vmax.xlane.f32.xlu0 %v3841_v34  ;;  %v3852_v12 = vsel %vm1755_vm14, %v1748_v42, -1e+30  ;;  %v1541_v15 = vsub.f32 %v3719_v1, %v1525_v58 }
 0x6ad   :  { %v1577_v57 = vsel %vm1576_vm9, %v3700_v38, %v1575_v52  ;;  %v1527_v19 = vmul.f32 2.0, %v3818_v25  ;;  %v1540_v44 = vsub.f32 %v3726_v3, %v1524_v9  ;;  %v1593_v38 = vand.u32 2147483648, %v3732_v43 }
 0x6ae   :  { %v1542_v36 = vsub.f32 %v3740_v6, %v1526_v55  ;;  %v1580_v13 = vsel %vm1578_vm10, %v1579_v63, %v1577_v57  ;;  %1974 = vmax.xlane.f32.xlu1 %v3852_v12  ;;  %v1598_v50 = vsel %vm1597_vm11, %v3721_v47, %v1596_v51  ;;  %v1589_v6 = vmul.f32 %v2804_v7, %v3732_v43 }
 0x6af   :  { %v2806_v39 = vpop.eup %2805  ;;  %v1601_v33 = vsel %vm1599_vm12, %v1600_v20, %v1598_v50  ;;  %2807 = vrsqrt.f32 %v3790_v18  ;;  %v3870_v1 = vsel %vm1755_vm14, %v1746_v60, -1e+30  ;;  %v3874_v63 = vsel %vm1755_vm14, %v1675_v62, -1e+30 }
 0x6b0   :  { %v1674_v26 = vsub.f32 0.0, %v1580_v13  ;;  %v1591_v3 = vsel %vm1590_vm13, %v3732_v43, %v1589_v6  ;;  %v3879_v21 = vmax.f32 %v1542_v36, 0.0  ;;  %1972 = vmax.xlane.f32.xlu0 %v3870_v1  ;;  %v1677_v47 = vsub.f32 0.0, %v1601_v33 }
 0x6b1   :  { %v1594_v2 = vsel %vm1592_vm15, %v1593_v38, %v1591_v3  ;;  %v1603_v4 = vmul.f32 %v2806_v39, %v3756_v27  ;;  %v3885_v20 = vmax.f32 %v1539_v22, 0.0  ;;  %v3887_v30 = vmax.f32 %v1538_v8, 0.0 }
 0x6b2   :  { %v1543_v28 = vsub.f32 %v3730_v14, %v1527_v19  ;;  %1794 = vmax.xlane.f32.xlu1 %v3874_v63  ;;  %vm1604_vm0 = vcmp.eq.f32.partialorder %v3756_v27, inf  ;;  %v3892_v29 = vmax.f32 %v1541_v15, 0.0  ;;  %v1607_v42 = vand.u32 2147483648, %v3756_v27 }
 0x6b3   :  { %v1605_v41 = vsel %vm1604_vm0, %v3756_v27, %v1603_v4  ;;  %2809 = vrsqrt.f32 %v3809_v31  ;;  %v3899_v43 = vsel %vm1755_vm14, %v1674_v26, -1e+30  ;;  %v1676_v22 = vsub.f32 0.0, %v1594_v2 }
 0x6b4   :  { %vm1606_vm1 = vcmp.eq.f32.partialorder %v3756_v27, 0.0  ;;  %2811 = vrsqrt.f32 %v3816_v24  ;;  %v3903_v14 = vmax.f32 %v1540_v44, 0.0  ;;  %1792 = vmax.xlane.f32.xlu0 %v3899_v43  ;;  %v3909_v58 = vsel %vm1755_vm14, %v1677_v47, -1e+30 }
 0x6b5   :  { %2813 = vrsqrt.f32 %v3879_v21  ;;  %v1608_v48 = vsel %vm1606_vm1, %v1607_v42, %v1605_v41  ;;  %v3911_v10 = vmax.f32 %v1543_v28, 0.0  ;;  %v1750_v27 = vmul.f32 %v3800_v0, %v1283_v49 }
 0x6b6   :  { %1798 = vmax.xlane.f32.xlu1 %v3909_v58  ;;  %2815 = vrsqrt.f32 %v3885_v20  ;;  %v3919_v52 = vsel %vm1755_vm14, %v1676_v22, -1e+30  ;;  %v1678_v17 = vsub.f32 0.0, %v1608_v48  ;;  %vm1611_vm2 = vcmp.eq.f32.partialorder %v3790_v18, inf }
 0x6b7   :  { %2817 = vrsqrt.f32 %v3887_v30  ;;  %vm1613_vm3 = vcmp.eq.f32.partialorder %v3790_v18, 0.0  ;;  %v1752_v49 = vmul.f32 %v3814_v5, %v3818_v25  ;;  %v3935_v55 = vsel %vm1755_vm14, %v1750_v27, -1e+30 }
 0x6b8   :  { %2819 = vrsqrt.f32 %v3892_v29  ;;  %1796 = vmax.xlane.f32.xlu0 %v3919_v52  ;;  %v3929_v0 = vsel %vm1755_vm14, %v1678_v17, -1e+30  ;;  %v1614_v62 = vand.u32 2147483648, %v3790_v18  ;;  %vm1625_vm4 = vcmp.eq.f32.partialorder %v3809_v31, inf }
 0x6b9   :  { %2821 = vrsqrt.f32 %v3903_v14  ;;  %vm1627_vm5 = vcmp.eq.f32.partialorder %v3809_v31, 0.0  ;;  %v1628_v57 = vand.u32 2147483648, %v3809_v31  ;;  %vm1618_vm6 = vcmp.eq.f32.partialorder %v3816_v24, inf }
 0x6ba   :  { %2823 = vrsqrt.f32 %v3911_v10  ;;  %vm1620_vm7 = vcmp.eq.f32.partialorder %v3816_v24, 0.0  ;;  %v3947_v5 = vsel %vm1755_vm14, %v1752_v49, -1e+30  ;;  %v1621_v51 = vand.u32 2147483648, %v3816_v24 }
 0x6bb   :  { %vm1639_vm8 = vcmp.eq.f32.partialorder %v3885_v20, inf  ;;  %vm1641_vm9 = vcmp.eq.f32.partialorder %v3885_v20, 0.0  ;;  %v1642_v36 = vand.u32 2147483648, %v3885_v20  ;;  %vm1632_vm10 = vcmp.eq.f32.partialorder %v3887_v30, inf }
 0x6bc   :  { %v2808_v9 = vpop.eup %2807  ;;  %1800 = vmax.xlane.f32.xlu0 %v3929_v0  ;;  %vm1634_vm11 = vcmp.eq.f32.partialorder %v3887_v30, 0.0  ;;  %v1635_v19 = vand.u32 2147483648, %v3887_v30  ;;  %vm1653_vm12 = vcmp.eq.f32.partialorder %v3892_v29, inf  ;;  %vm1655_vm13 = vcmp.eq.f32.partialorder %v3892_v29, 0.0 }
 0x6bd   :  { %v1610_v60 = vmul.f32 %v2808_v9, %v3790_v18  ;;  %vm1646_vm15 = vcmp.eq.f32.partialorder %v3903_v14, inf  ;;  %vm1648_vm0 = vcmp.eq.f32.partialorder %v3903_v14, 0.0  ;;  %v1649_v26 = vand.u32 2147483648, %v3903_v14 }
 0x6be   :  { %vm1667_vm1 = vcmp.eq.f32.partialorder %v3911_v10, inf }
 0x6bf   :  { %v1612_v25 = vsel %vm1611_vm2, %v3790_v18, %v1610_v60  ;;  %v1656_v18 = vand.u32 2147483648, %v3892_v29  ;;  %vm1660_vm2 = vcmp.eq.f32.partialorder %v3879_v21, inf }
 0x6c0   :  { %v2810_v7 = vpop.eup %2809  ;;  %v1615_v8 = vsel %vm1613_vm3, %v1614_v62, %v1612_v25  ;;  %vm1669_vm3 = vcmp.eq.f32.partialorder %v3911_v10, 0.0 }
 0x6c1   :  { %v2812_v13 = vpop.eup %2811  ;;  %v1679_v39 = vsub.f32 0.0, %v1615_v8  ;;  %v1624_v15 = vmul.f32 %v2810_v7, %v3809_v31 }
 0x6c2   :  { %v2814_v50 = vpop.eup %2813  ;;  %v1617_v6 = vmul.f32 %v2812_v13, %v3816_v24 }
 0x6c3   :  { %v2816_v44 = vpop.eup %2815  ;;  %v3967_v33 = vsel %vm1755_vm14, %v1679_v39, -1e+30  ;;  %v1626_v38 = vsel %vm1625_vm4, %v3809_v31, %v1624_v15  ;;  %v1659_v9 = vmul.f32 %v2814_v50, %v3879_v21  ;;  %v1670_v15 = vand.u32 2147483648, %v3911_v10 }
 0x6c4   :  { %v2818_v3 = vpop.eup %2817  ;;  %1802 = vmax.xlane.f32.xlu1 %v3967_v33  ;;  %v1629_v47 = vsel %vm1627_vm5, %v1628_v57, %v1626_v38  ;;  %v1619_v2 = vsel %vm1618_vm6, %v3816_v24, %v1617_v6  ;;  %v1638_v4 = vmul.f32 %v2816_v44, %v3885_v20  ;;  %vm1662_vm4 = vcmp.eq.f32.partialorder %v3879_v21, 0.0 }
 0x6c5   :  { %v2820_v28 = vpop.eup %2819  ;;  %v1681_v41 = vsub.f32 0.0, %v1629_v47  ;;  %v1622_v42 = vsel %vm1620_vm7, %v1621_v51, %v1619_v2  ;;  %v1631_v22 = vmul.f32 %v2818_v3, %v3887_v30 }
 0x6c6   :  { %v2822_v48 = vpop.eup %2821  ;;  %v1680_v31 = vsub.f32 0.0, %v1622_v42  ;;  %v1640_v27 = vsel %vm1639_vm8, %v3885_v20, %v1638_v4  ;;  %v1652_v17 = vmul.f32 %v2820_v28, %v3892_v29 }
 0x6c7   :  { %v2824_v49 = vpop.eup %2823  ;;  %v3993_v60 = vsel %vm1755_vm14, %v1681_v41, -1e+30  ;;  %v1643_v24 = vsel %vm1641_vm9, %v1642_v36, %v1640_v27  ;;  %v1633_v62 = vsel %vm1632_vm10, %v3887_v30, %v1631_v22  ;;  %v1645_v57 = vmul.f32 %v2822_v48, %v3903_v14 }
 0x6c8   :  { %1806 = vmax.xlane.f32.xlu1 %v3993_v60  ;;  %v4004_v25 = vsel %vm1755_vm14, %v1680_v31, -1e+30  ;;  %v1683_v51 = vsub.f32 0.0, %v1643_v24  ;;  %v1636_v7 = vsel %vm1634_vm11, %v1635_v19, %v1633_v62  ;;  %v1654_v20 = vsel %vm1653_vm12, %v3892_v29, %v1652_v17 }
 0x6c9   :  { %1804 = vmax.xlane.f32.xlu0 %v4004_v25  ;;  %v1682_v8 = vsub.f32 0.0, %v1636_v7  ;;  %v1657_v36 = vsel %vm1655_vm13, %v1656_v18, %v1654_v20  ;;  %v1647_v13 = vsel %vm1646_vm15, %v3903_v14, %v1645_v57  ;;  %v1666_v39 = vmul.f32 %v2824_v49, %v3911_v10 }
 0x6ca   :  { %v1650_v30 = vsel %vm1648_vm0, %v1649_v26, %v1647_v13  ;;  %v1661_v19 = vsel %vm1660_vm2, %v3879_v21, %v1659_v9  ;;  %v4027_v29 = vsel %vm1755_vm14, %v1683_v51, -1e+30  ;;  %v1685_v50 = vsub.f32 0.0, %v1657_v36 }
 0x6cb   :  { %v1668_v6 = vsel %vm1667_vm1, %v3911_v10, %v1666_v39  ;;  %v1663_v14 = vand.u32 2147483648, %v3879_v21  ;;  %v4036_v18 = vsel %vm1755_vm14, %v1682_v8, -1e+30  ;;  %v1684_v44 = vsub.f32 0.0, %v1650_v30 }
 0x6cc   :  { %1810 = vmax.xlane.f32.xlu1 %v4027_v29  ;;  %v1671_v38 = vsel %vm1669_vm3, %v1670_v15, %v1668_v6  ;;  %v4042_v3 = vsel %vm1755_vm14, %v1685_v50, -1e+30 }
 0x6cd   :  { %1808 = vmax.xlane.f32.xlu0 %v4036_v18  ;;  %v1664_v26 = vsel %vm1662_vm4, %v1663_v14, %v1661_v19  ;;  %v1687_v10 = vsub.f32 0.0, %v1671_v38  ;;  %v4047_v47 = vsel %vm1755_vm14, %v1684_v44, -1e+30 }
 0x6ce   :  { %v1686_v2 = vsub.f32 0.0, %v1664_v26 }
 0x6cf   :  { %v4052_v21 = vsel %vm1755_vm14, %v1687_v10, -1e+30 }
 0x6d0   :  { %1814 = vmax.xlane.f32.xlu1 %v4042_v3  ;;  %v4057_v4 = vsel %vm1755_vm14, %v1686_v2, -1e+30 }
 0x6d1   :  { %1812 = vmax.xlane.f32.xlu0 %v4047_v47 }
 0x6d4   :  { %1818 = vmax.xlane.f32.xlu1 %v4052_v21 }
 0x6d5   :  { %1816 = vmax.xlane.f32.xlu0 %v4057_v4 }
 0x6d8   :  { %1978 = vmax.xlane.f32.xlu1 %v3947_v5 }
 0x6d9   :  { %1976 = vmax.xlane.f32.xlu0 %v3935_v55 }
 0x71a   :  { %v1951_v28 = vpop.xlane.xlu1 %1950 }
 0x71b   :  { %v4063_v41 = vsub.f32 %v3654_v23, %v1951_v28 }
 0x71c   :  { %v1949_v42 = vpop.xlane.xlu0 %1948 }
 0x71d   :  { %v1998_v22 = vmul.f32 1.442695, %v4063_v41  ;;  %v4067_v48 = vsub.f32 %v3668_v40, %v1949_v42 }
 0x71f   :  { %2825 = vpow2.f32 %v1998_v22  ;;  %v1996_v59 = vmul.f32 1.442695, %v4067_v48  ;;  %v1955_v31 = vpop.xlane.xlu1 %1954 }
 0x720   :  { %v4071_v27 = vsub.f32 %v3676_v16, %v1955_v31  ;;  %v1953_v17 = vpop.xlane.xlu0 %1952 }
 0x721   :  { %2827 = vpow2.f32 %v1996_v59  ;;  %v4074_v9 = vsub.f32 %v3690_v61, %v1953_v17 }
 0x722   :  { %v2002_v23 = vmul.f32 1.442695, %v4071_v27 }
 0x723   :  { %v2000_v49 = vmul.f32 1.442695, %v4074_v9  ;;  %v1959_v24 = vpop.xlane.xlu1 %1958 }
 0x724   :  { %2829 = vpow2.f32 %v2002_v23  ;;  %v4079_v40 = vsub.f32 %v3704_v35, %v1959_v24  ;;  %v1957_v62 = vpop.xlane.xlu0 %1956 }
 0x725   :  { %2831 = vpow2.f32 %v2000_v49  ;;  %v4082_v57 = vsub.f32 %v3715_v56, %v1957_v62 }
 0x726   :  { %v2006_v16 = vmul.f32 1.442695, %v4079_v40 }
 0x727   :  { %v2004_v51 = vmul.f32 1.442695, %v4082_v57  ;;  %v1963_v61 = vpop.xlane.xlu1 %1962 }
 0x728   :  { %2833 = vpow2.f32 %v2006_v16  ;;  %v4087_v7 = vsub.f32 %v3736_v37, %v1963_v61  ;;  %v1961_v20 = vpop.xlane.xlu0 %1960 }
 0x729   :  { %2835 = vpow2.f32 %v2004_v51  ;;  %v4090_v8 = vsub.f32 %v3747_v32, %v1961_v20 }
 0x72a   :  { %v2010_v35 = vmul.f32 1.442695, %v4087_v7 }
 0x72b   :  { %v2008_v36 = vmul.f32 1.442695, %v4090_v8  ;;  %v1967_v56 = vpop.xlane.xlu1 %1966 }
 0x72c   :  { %v2826_v13 = vpop.eup %2825  ;;  %2837 = vpow2.f32 %v2010_v35  ;;  %v4095_v39 = vsub.f32 %v3761_v46, %v1967_v56  ;;  %v1965_v30 = vpop.xlane.xlu0 %1964 }
 0x72d   :  { %2839 = vpow2.f32 %v2008_v36  ;;  %2030 = vadd.xlane.f32.xlu1 %v2826_v13  ;;  %v4099_v19 = vsub.f32 %v3772_v54, %v1965_v30 }
 0x72e   :  { %v2828_v37 = vpop.eup %2827  ;;  %v2014_v15 = vmul.f32 1.442695, %v4095_v39 }
 0x72f   :  { %v1971_v32 = vpop.xlane.xlu1 %1970  ;;  %2028 = vadd.xlane.f32.xlu0 %v2828_v37  ;;  %v2012_v50 = vmul.f32 1.442695, %v4099_v19 }
 0x730   :  { %2841 = vpow2.f32 %v2014_v15  ;;  %v4103_v6 = vsub.f32 %v3783_v11, %v1971_v32  ;;  %v1969_v46 = vpop.xlane.xlu0 %1968 }
 0x731   :  { %v2830_v14 = vpop.eup %2829  ;;  %2843 = vpow2.f32 %v2012_v50  ;;  %v4107_v26 = vsub.f32 %v3797_v53, %v1969_v46 }
 0x732   :  { %v2832_v44 = vpop.eup %2831  ;;  %v2018_v38 = vmul.f32 1.442695, %v4103_v6  ;;  %2034 = vadd.xlane.f32.xlu1 %v2830_v14 }
 0x733   :  { %2032 = vadd.xlane.f32.xlu0 %v2832_v44  ;;  %v2016_v54 = vmul.f32 1.442695, %v4107_v26  ;;  %v1791_v10 = vpop.xlane.xlu1 %1790 }
 0x734   :  { %2845 = vpow2.f32 %v2018_v38  ;;  %v4111_v28 = vsub.f32 %v3830_v45, %v1791_v10 }
 0x735   :  { %v2834_v2 = vpop.eup %2833  ;;  %2847 = vpow2.f32 %v2016_v54  ;;  %v1789_v22 = vpop.xlane.xlu0 %1788 }
 0x736   :  { %v2836_v11 = vpop.eup %2835  ;;  %2038 = vadd.xlane.f32.xlu1 %v2834_v2  ;;  %v1838_v42 = vmul.f32 1.442695, %v4111_v28  ;;  %v4115_v53 = vsub.f32 %v3841_v34, %v1789_v22 }
 0x737   :  { %2036 = vadd.xlane.f32.xlu0 %v2836_v11  ;;  %v1975_v59 = vpop.xlane.xlu1 %1974 }
 0x738   :  { %2849 = vpow2.f32 %v1838_v42  ;;  %v4118_v17 = vsub.f32 %v3852_v12, %v1975_v59  ;;  %v1836_v45 = vmul.f32 1.442695, %v4115_v53 }
 0x739   :  { %v2838_v31 = vpop.eup %2837  ;;  %v1973_v24 = vpop.xlane.xlu0 %1972 }
 0x73a   :  { %v2840_v23 = vpop.eup %2839  ;;  %2042 = vadd.xlane.f32.xlu1 %v2838_v31  ;;  %v2022_v49 = vmul.f32 1.442695, %v4118_v17  ;;  %2851 = vpow2.f32 %v1836_v45  ;;  %v4123_v62 = vsub.f32 %v3870_v1, %v1973_v24 }
 0x73b   :  { %2040 = vadd.xlane.f32.xlu0 %v2840_v23  ;;  %v1795_v34 = vpop.xlane.xlu1 %1794 }
 0x73c   :  { %2853 = vpow2.f32 %v2022_v49  ;;  %v4126_v51 = vsub.f32 %v3874_v63, %v1795_v34  ;;  %v2020_v12 = vmul.f32 1.442695, %v4123_v62 }
 0x73d   :  { %v2842_v16 = vpop.eup %2841  ;;  %v1793_v35 = vpop.xlane.xlu0 %1792 }
 0x73e   :  { %2046 = vadd.xlane.f32.xlu1 %v2842_v16  ;;  %v2844_v61 = vpop.eup %2843  ;;  %v1842_v20 = vmul.f32 1.442695, %v4126_v51  ;;  %2855 = vpow2.f32 %v2020_v12  ;;  %v4131_v36 = vsub.f32 %v3899_v43, %v1793_v35 }
 0x73f   :  { %v1799_v56 = vpop.xlane.xlu1 %1798  ;;  %2044 = vadd.xlane.f32.xlu0 %v2844_v61 }
 0x740   :  { %2857 = vpow2.f32 %v1842_v20  ;;  %v4134_v13 = vsub.f32 %v3909_v58, %v1799_v56  ;;  %v1840_v63 = vmul.f32 1.442695, %v4131_v36 }
 0x741   :  { %v2846_v1 = vpop.eup %2845  ;;  %v1797_v15 = vpop.xlane.xlu0 %1796 }
 0x742   :  { %2050 = vadd.xlane.f32.xlu1 %v2846_v1  ;;  %v2848_v30 = vpop.eup %2847  ;;  %v1846_v37 = vmul.f32 1.442695, %v4134_v13  ;;  %2859 = vpow2.f32 %v1840_v63  ;;  %v4139_v32 = vsub.f32 %v3919_v52, %v1797_v15 }
 0x743   :  { %2048 = vadd.xlane.f32.xlu0 %v2848_v30 }
 0x744   :  { %2861 = vpow2.f32 %v1846_v37  ;;  %v1844_v50 = vmul.f32 1.442695, %v4139_v32 }
 0x745   :  { %v2850_v43 = vpop.eup %2849  ;;  %v1801_v14 = vpop.xlane.xlu0 %1800 }
 0x746   :  { %1870 = vadd.xlane.f32.xlu1 %v2850_v43  ;;  %2863 = vpow2.f32 %v1844_v50  ;;  %v4143_v58 = vsub.f32 %v3929_v0, %v1801_v14 }
 0x747   :  { %v2852_v46 = vpop.eup %2851 }
 0x748   :  { %v1848_v38 = vmul.f32 1.442695, %v4143_v58  ;;  %1868 = vadd.xlane.f32.xlu0 %v2852_v46 }
 0x749   :  { %v2854_v44 = vpop.eup %2853 }
 0x74a   :  { %2054 = vadd.xlane.f32.xlu1 %v2854_v44  ;;  %2865 = vpow2.f32 %v1848_v38 }
 0x74b   :  { %v2856_v52 = vpop.eup %2855 }
 0x74c   :  { %2052 = vadd.xlane.f32.xlu0 %v2856_v52 }
 0x74d   :  { %v2858_v54 = vpop.eup %2857  ;;  %v1803_v10 = vpop.xlane.xlu1 %1802 }
 0x74e   :  { %v4147_v2 = vsub.f32 %v3967_v33, %v1803_v10  ;;  %1874 = vadd.xlane.f32.xlu1 %v2858_v54 }
 0x74f   :  { %v2860_v11 = vpop.eup %2859 }
 0x750   :  { %v1850_v42 = vmul.f32 1.442695, %v4147_v2  ;;  %1872 = vadd.xlane.f32.xlu0 %v2860_v11 }
 0x751   :  { %v2862_v0 = vpop.eup %2861  ;;  %v1807_v22 = vpop.xlane.xlu1 %1806 }
 0x752   :  { %2867 = vpow2.f32 %v1850_v42  ;;  %v4151_v59 = vsub.f32 %v3993_v60, %v1807_v22  ;;  %v1805_v31 = vpop.xlane.xlu0 %1804  ;;  %1878 = vadd.xlane.f32.xlu1 %v2862_v0 }
 0x753   :  { %v4154_v23 = vsub.f32 %v4004_v25, %v1805_v31  ;;  %v2864_v45 = vpop.eup %2863 }
 0x754   :  { %v1854_v33 = vmul.f32 1.442695, %v4151_v59  ;;  %1876 = vadd.xlane.f32.xlu0 %v2864_v45 }
 0x755   :  { %v1852_v49 = vmul.f32 1.442695, %v4154_v23  ;;  %v1811_v24 = vpop.xlane.xlu1 %1810 }
 0x756   :  { %2869 = vpow2.f32 %v1854_v33  ;;  %v4159_v34 = vsub.f32 %v4027_v29, %v1811_v24  ;;  %v1809_v16 = vpop.xlane.xlu0 %1808 }
 0x757   :  { %2871 = vpow2.f32 %v1852_v49  ;;  %v4162_v60 = vsub.f32 %v4036_v18, %v1809_v16  ;;  %v2866_v12 = vpop.eup %2865 }
 0x758   :  { %v1858_v25 = vmul.f32 1.442695, %v4159_v34  ;;  %1880 = vadd.xlane.f32.xlu0 %v2866_v12 }
 0x759   :  { %v1856_v61 = vmul.f32 1.442695, %v4162_v60  ;;  %v1815_v20 = vpop.xlane.xlu1 %1814 }
 0x75a   :  { %2873 = vpow2.f32 %v1858_v25  ;;  %v4167_v35 = vsub.f32 %v4042_v3, %v1815_v20  ;;  %v1813_v56 = vpop.xlane.xlu0 %1812 }
 0x75b   :  { %2875 = vpow2.f32 %v1856_v61  ;;  %v4170_v29 = vsub.f32 %v4047_v47, %v1813_v56 }
 0x75c   :  { %v1862_v1 = vmul.f32 1.442695, %v4167_v35 }
 0x75d   :  { %v1860_v18 = vmul.f32 1.442695, %v4170_v29  ;;  %v1819_v63 = vpop.xlane.xlu1 %1818 }
 0x75e   :  { %2877 = vpow2.f32 %v1862_v1  ;;  %v4175_v30 = vsub.f32 %v4052_v21, %v1819_v63  ;;  %v1817_v37 = vpop.xlane.xlu0 %1816 }
 0x75f   :  { %v2868_v15 = vpop.eup %2867  ;;  %2879 = vpow2.f32 %v1860_v18  ;;  %v4178_v3 = vsub.f32 %v4057_v4, %v1817_v37 }
 0x760   :  { %v1866_v43 = vmul.f32 1.442695, %v4175_v30  ;;  %1882 = vadd.xlane.f32.xlu1 %v2868_v15 }
 0x761   :  { %v1864_v47 = vmul.f32 1.442695, %v4178_v3  ;;  %v1979_v50 = vpop.xlane.xlu1 %1978 }
 0x762   :  { %2881 = vpow2.f32 %v1866_v43  ;;  %v4183_v14 = vsub.f32 %v3947_v5, %v1979_v50  ;;  %v1977_v46 = vpop.xlane.xlu0 %1976 }
 0x763   :  { %v2870_v44 = vpop.eup %2869  ;;  %2883 = vpow2.f32 %v1864_v47  ;;  %v4186_v21 = vsub.f32 %v3935_v55, %v1977_v46 }
 0x764   :  { %v2872_v38 = vpop.eup %2871  ;;  %v2026_v4 = vmul.f32 1.442695, %v4183_v14  ;;  %1886 = vadd.xlane.f32.xlu1 %v2870_v44 }
 0x765   :  { %v2024_v52 = vmul.f32 1.442695, %v4186_v21  ;;  %1884 = vadd.xlane.f32.xlu0 %v2872_v38 }
 0x766   :  { %2885 = vpow2.f32 %v2026_v4 }
 0x767   :  { %v2874_v54 = vpop.eup %2873  ;;  %2887 = vpow2.f32 %v2024_v52 }
 0x768   :  { %v2876_v10 = vpop.eup %2875  ;;  %1890 = vadd.xlane.f32.xlu1 %v2874_v54 }
 0x769   :  { %1888 = vadd.xlane.f32.xlu0 %v2876_v10 }
 0x76b   :  { %v2878_v5 = vpop.eup %2877 }
 0x76c   :  { %v2880_v11 = vpop.eup %2879  ;;  %1894 = vadd.xlane.f32.xlu1 %v2878_v5 }
 0x76d   :  { %1892 = vadd.xlane.f32.xlu0 %v2880_v11 }
 0x76f   :  { %v2882_v42 = vpop.eup %2881 }
 0x770   :  { %v2884_v55 = vpop.eup %2883  ;;  %1898 = vadd.xlane.f32.xlu1 %v2882_v42 }
 0x771   :  { %1896 = vadd.xlane.f32.xlu0 %v2884_v55 }
 0x773   :  { %v2886_v0 = vpop.eup %2885 }
 0x774   :  { %v2888_v22 = vpop.eup %2887  ;;  %2058 = vadd.xlane.f32.xlu1 %v2886_v0 }
 0x775   :  { %2056 = vadd.xlane.f32.xlu0 %v2888_v22 }
 0x776   :  { %3084 = shalt.err (!%p3081_p6)
}
 0x777   :  { %2195 = dma.vmem_to_hbm [thread:$0]  %s2190_s30, 2048, %s4265_s10, [#allocation15], %s3153_s26, %s3153_s26, %s3154_s27  }
 0x778   :  { %s3093_s4 = scalar_lea.vmem %s2178_s13, 2048  ;;  %p3098_p8 = scmp.lt.s32.totalorder %s2178_s13, %s2178_s13 }
 0x779   :  { %p3094_p7 = scmp.ne.s32.totalorder %s2178_s13, %s3093_s4  ;;  %p3099_p9 = scmp.lt.s32.totalorder %s3093_s4, %s3093_s4 }
 0x77b   :  { %p3100_p10 = por %p3099_p9, %p3098_p8 }
 0x77d   :  { %p3101_p11 = pnand %p3100_p10, %p3094_p7 }
 0x77f   :  { %3104 = shalt.err (!%p3101_p11)
}
 0x780   :  { %2183 = dma.vmem_to_hbm [thread:$0]  %s2178_s13, 2048, %s4264_s9, [#allocation4], %s3153_s26, %s3153_s26, %s3154_s27  }
 0x781   :  { %s3157_s9 = smov [#allocation16]  }
 0x782   :  { %s2201_s10 = sshll.u32 %s3157_s9, 4  ;;  %s2202_s10 = int_to_ptr.vmem [resolvable:$true] %s2201_s10 }
 0x783   :  { %s3113_s18 = scalar_lea.vmem %s2202_s10, 2048  ;;  %p3118_p13 = scmp.lt.s32.totalorder %s2202_s10, %s2202_s10 }
 0x784   :  { %p3114_p12 = scmp.ne.s32.totalorder %s2202_s10, %s3113_s18  ;;  %p3119_p0 = scmp.lt.s32.totalorder %s3113_s18, %s3113_s18 }
 0x786   :  { %p3120_p1 = por %p3119_p0, %p3118_p13 }
 0x788   :  { %p3121_p2 = pnand %p3120_p1, %p3114_p12 }
 0x7b6   :  { %v2031_v31 = vpop.xlane.xlu1 %2030 }
 0x7b7   :  { %2889 = vlog2.f32 %v2031_v31 }
 0x7b8   :  { %v2029_v45 = vpop.xlane.xlu0 %2028 }
 0x7b9   :  { %2891 = vlog2.f32 %v2029_v45 }
 0x7bb   :  { %v2035_v33 = vpop.xlane.xlu1 %2034 }
 0x7bc   :  { %v2033_v49 = vpop.xlane.xlu0 %2032 }
 0x7bf   :  { %v2039_v24 = vpop.xlane.xlu1 %2038 }
 0x7c0   :  { %v2037_v16 = vpop.xlane.xlu0 %2036 }
 0x7c3   :  { %v2043_v12 = vpop.xlane.xlu1 %2042 }
 0x7c4   :  { %v2041_v25 = vpop.xlane.xlu0 %2040  ;;  %v2890_v47 = vpop.eup %2889 }
 0x7c5   :  { %v2063_v38 = vmul.f32 0.6931472, %v2890_v47 }
 0x7c6   :  { %v2892_v44 = vpop.eup %2891 }
 0x7c7   :  { %v2047_v61 = vpop.xlane.xlu1 %2046  ;;  %v2061_v10 = vmul.f32 0.6931472, %v2892_v44  ;;  %v2093_v11 = vsub.f32 %v4063_v41, %v2063_v38 }
 0x7c8   :  { %v4202_v20 = vpop.xlane.xlu0 %2044 }
 0x7cb   :  { %v4204_v56 = vpop.xlane.xlu1 %2050 }
 0x7cc   :  { %v4206_v1 = vpop.xlane.xlu0 %2048 }
 0x7cf   :  { %v1871_v18 = vpop.xlane.xlu1 %1870 }
 0x7d0   :  { %2893 = vlog2.f32 %v1871_v18 }
 0x7d1   :  { %v1869_v63 = vpop.xlane.xlu0 %1868 }
 0x7d2   :  { %2895 = vlog2.f32 %v1869_v63 }
 0x7d3   :  { %v4208_v37 = vpop.xlane.xlu1 %2054  ;;  %2897 = vlog2.f32 %v2035_v33  ;;  %v2092_v33 = vsub.f32 %v4067_v48, %v2061_v10 }
 0x7d4   :  { %2899 = vlog2.f32 %v2033_v49 }
 0x7d5   :  { %v4210_v15 = vpop.xlane.xlu0 %2052  ;;  %2901 = vlog2.f32 %v2039_v24 }
 0x7d7   :  { %v1875_v43 = vpop.xlane.xlu1 %1874 }
 0x7d8   :  { %2903 = vlog2.f32 %v1875_v43 }
 0x7d9   :  { %2905 = vlog2.f32 %v2037_v16  ;;  %v1873_v50 = vpop.xlane.xlu0 %1872 }
 0x7da   :  { %2907 = vlog2.f32 %v1873_v50 }
 0x7db   :  { %v1879_v46 = vpop.xlane.xlu1 %1878 }
 0x7dc   :  { %2909 = vlog2.f32 %v1879_v46 }
 0x7dd   :  { %v2894_v4 = vpop.eup %2893  ;;  %2911 = vlog2.f32 %v2041_v25  ;;  %v1877_v54 = vpop.xlane.xlu0 %1876 }
 0x7de   :  { %v1903_v52 = vmul.f32 0.6931472, %v2894_v4  ;;  %2913 = vlog2.f32 %v1877_v54 }
 0x7df   :  { %v2896_v5 = vpop.eup %2895 }
 0x7e0   :  { %v1933_v42 = vsub.f32 %v4111_v28, %v1903_v52  ;;  %v2898_v55 = vpop.eup %2897  ;;  %v1901_v0 = vmul.f32 0.6931472, %v2896_v5 }
 0x7e1   :  { %v1881_v31 = vpop.xlane.xlu0 %1880  ;;  %v2900_v45 = vpop.eup %2899  ;;  %v2067_v16 = vmul.f32 0.6931472, %v2898_v55 }
 0x7e2   :  { %v2109_v22 = vadd.f32 %v2093_v11, %v1933_v42  ;;  %v1932_v49 = vsub.f32 %v4115_v53, %v1901_v0  ;;  %2915 = vlog2.f32 %v1881_v31  ;;  %v2902_v24 = vpop.eup %2901  ;;  %v2065_v28 = vmul.f32 0.6931472, %v2900_v45 }
 0x7e3   :  { %2917 = vlog2.f32 %v2043_v12  ;;  %v2095_v46 = vsub.f32 %v4071_v27, %v2067_v16  ;;  %v2071_v44 = vmul.f32 0.6931472, %v2902_v24 }
 0x7e4   :  { %v2125_v25 = vmul.f32 0.5, %v2109_v22  ;;  %v2108_v63 = vadd.f32 %v2092_v33, %v1932_v49  ;;  %2919 = vlog2.f32 %v2047_v61  ;;  %v2094_v5 = vsub.f32 %v4074_v9, %v2065_v28 }
 0x7e5   :  { %v2904_v18 = vpop.eup %2903  ;;  %v2097_v42 = vsub.f32 %v4079_v40, %v2071_v44 }
 0x7e6   :  { %2157 = vst [vmem:[#allocation16 + $0x8] sm:$0xff] %v2125_v25  ;;  %v1907_v41 = vmul.f32 0.6931472, %v2904_v18  ;;  %v2906_v43 = vpop.eup %2905  ;;  %v2124_v47 = vmul.f32 0.5, %v2108_v63 }
 0x7e7   :  { %v2908_v50 = vpop.eup %2907  ;;  %v2069_v52 = vmul.f32 0.6931472, %v2906_v43 }
 0x7e8   :  { %v1935_v48 = vsub.f32 %v4126_v51, %v1907_v41  ;;  %2156 = vst [vmem:[#allocation16] sm:$0xff] %v2124_v47  ;;  %v1905_v53 = vmul.f32 0.6931472, %v2908_v50 }
 0x7e9   :  { %v2910_v38 = vpop.eup %2909  ;;  %v1883_v4 = vpop.xlane.xlu1 %1882  ;;  %v2096_v31 = vsub.f32 %v4082_v57, %v2069_v52 }
 0x7ea   :  { %v2111_v54 = vadd.f32 %v2095_v46, %v1935_v48  ;;  %v1911_v10 = vmul.f32 0.6931472, %v2910_v38  ;;  %2921 = vlog2.f32 %v1883_v4  ;;  %v2912_v12 = vpop.eup %2911  ;;  %v1934_v11 = vsub.f32 %v4131_v36, %v1905_v53 }
 0x7eb   :  { %2923 = vlog2.f32 %v4202_v20  ;;  %v2914_v27 = vpop.eup %2913  ;;  %v2073_v36 = vmul.f32 0.6931472, %v2912_v12 }
 0x7ec   :  { %2925 = vlog2.f32 %v4204_v56  ;;  %v2127_v51 = vmul.f32 0.5, %v2111_v54  ;;  %v1937_v61 = vsub.f32 %v4134_v13, %v1911_v10  ;;  %v2110_v55 = vadd.f32 %v2094_v5, %v1934_v11 }
 0x7ed   :  { %2927 = vlog2.f32 %v4206_v1  ;;  %v1909_v0 = vmul.f32 0.6931472, %v2914_v27  ;;  %v1887_v22 = vpop.xlane.xlu1 %1886  ;;  %v2098_v16 = vsub.f32 %v4090_v8, %v2073_v36 }
 0x7ee   :  { %2159 = vst [vmem:[#allocation16 + $0x18] sm:$0xff] %v2127_v51  ;;  %v2113_v9 = vadd.f32 %v2097_v42, %v1937_v61  ;;  %2929 = vlog2.f32 %v1887_v22  ;;  %v1885_v20 = vpop.xlane.xlu0 %1884  ;;  %v2126_v45 = vmul.f32 0.5, %v2110_v55 }
 0x7ef   :  { %v1936_v40 = vsub.f32 %v4139_v32, %v1909_v0  ;;  %2931 = vlog2.f32 %v1885_v20  ;;  %v2916_v56 = vpop.eup %2915 }
 0x7f0   :  { %2933 = vlog2.f32 %v4208_v37  ;;  %v2129_v13 = vmul.f32 0.5, %v2113_v9  ;;  %2158 = vst [vmem:[#allocation16 + $0x10] sm:$0xff] %v2126_v45  ;;  %v1913_v33 = vmul.f32 0.6931472, %v2916_v56  ;;  %v2918_v24 = vpop.eup %2917 }
 0x7f1   :  { %2935 = vlog2.f32 %v4210_v15  ;;  %v2112_v1 = vadd.f32 %v2096_v31, %v1936_v40  ;;  %v1891_v49 = vpop.xlane.xlu1 %1890  ;;  %v2920_v63 = vpop.eup %2919  ;;  %v2075_v41 = vmul.f32 0.6931472, %v2918_v24 }
 0x7f2   :  { %2161 = vst [vmem:[#allocation16 + $0x28] sm:$0xff] %v2129_v13  ;;  %2937 = vlog2.f32 %v1891_v49  ;;  %v1889_v57 = vpop.xlane.xlu0 %1888  ;;  %v1938_v32 = vsub.f32 %v4143_v58, %v1913_v33  ;;  %v2079_v44 = vmul.f32 0.6931472, %v2920_v63 }
 0x7f3   :  { %v2128_v25 = vmul.f32 0.5, %v2112_v1  ;;  %2939 = vlog2.f32 %v1889_v57  ;;  %v2099_v58 = vsub.f32 %v4087_v7, %v2075_v41 }
 0x7f4   :  { %v2114_v18 = vadd.f32 %v2098_v16, %v1938_v32  ;;  %v2101_v11 = vsub.f32 %v4095_v39, %v2079_v44 }
 0x7f5   :  { %2160 = vst [vmem:[#allocation16 + $0x20] sm:$0xff] %v2128_v25  ;;  %v1895_v37 = vpop.xlane.xlu1 %1894 }
 0x7f6   :  { %2941 = vlog2.f32 %v1895_v37  ;;  %v1893_v15 = vpop.xlane.xlu0 %1892  ;;  %v2130_v28 = vmul.f32 0.5, %v2114_v18 }
 0x7f7   :  { %v2922_v43 = vpop.eup %2921  ;;  %2943 = vlog2.f32 %v1893_v15 }
 0x7f8   :  { %v2924_v47 = vpop.eup %2923  ;;  %v1915_v50 = vmul.f32 0.6931472, %v2922_v43  ;;  %2162 = vst [vmem:[#allocation16 + $0x30] sm:$0xff] %v2130_v28 }
 0x7f9   :  { %v2926_v46 = vpop.eup %2925  ;;  %v1899_v8 = vpop.xlane.xlu1 %1898  ;;  %v2077_v52 = vmul.f32 0.6931472, %v2924_v47 }
 0x7fa   :  { %v2928_v48 = vpop.eup %2927  ;;  %v1939_v38 = vsub.f32 %v4147_v2, %v1915_v50  ;;  %2945 = vlog2.f32 %v1899_v8  ;;  %v1897_v53 = vpop.xlane.xlu0 %1896  ;;  %v2083_v61 = vmul.f32 0.6931472, %v2926_v46 }
 0x7fb   :  { %v2930_v4 = vpop.eup %2929  ;;  %2947 = vlog2.f32 %v1897_v53  ;;  %v2100_v22 = vsub.f32 %v4099_v19, %v2077_v52  ;;  %v2081_v31 = vmul.f32 0.6931472, %v2928_v48 }
 0x7fc   :  { %v2932_v54 = vpop.eup %2931  ;;  %v2115_v10 = vadd.f32 %v2099_v58, %v1939_v38  ;;  %v1919_v12 = vmul.f32 0.6931472, %v2930_v4  ;;  %v2103_v56 = vsub.f32 %v4103_v6, %v2083_v61 }
 0x7fd   :  { %v2934_v5 = vpop.eup %2933  ;;  %v1917_v27 = vmul.f32 0.6931472, %v2932_v54  ;;  %v2059_v42 = vpop.xlane.xlu1 %2058  ;;  %v2102_v49 = vsub.f32 %v4107_v26, %v2081_v31 }
 0x7fe   :  { %v2936_v51 = vpop.eup %2935  ;;  %v2131_v55 = vmul.f32 0.5, %v2115_v10  ;;  %v1941_v7 = vsub.f32 %v4151_v59, %v1919_v12  ;;  %2949 = vlog2.f32 %v2059_v42  ;;  %v2057_v2 = vpop.xlane.xlu0 %2056  ;;  %v2087_v13 = vmul.f32 0.6931472, %v2934_v5 }
 0x7ff   :  { %v2938_v0 = vpop.eup %2937  ;;  %v1940_v9 = vsub.f32 %v4154_v23, %v1917_v27  ;;  %2951 = vlog2.f32 %v2057_v2  ;;  %v2085_v19 = vmul.f32 0.6931472, %v2936_v51 }
 0x800   :  { %v2940_v20 = vpop.eup %2939  ;;  %2163 = vst [vmem:[#allocation16 + $0x38] sm:$0xff] %v2131_v55  ;;  %v2117_v36 = vadd.f32 %v2101_v11, %v1941_v7  ;;  %v1923_v39 = vmul.f32 0.6931472, %v2938_v0  ;;  %v2105_v6 = vsub.f32 %v4118_v17, %v2087_v13 }
 0x801   :  { %v2116_v45 = vadd.f32 %v2100_v22, %v1940_v9  ;;  %v1921_v40 = vmul.f32 0.6931472, %v2940_v20  ;;  %v2104_v41 = vsub.f32 %v4123_v62, %v2085_v19 }
 0x802   :  { %v2133_v1 = vmul.f32 0.5, %v2117_v36  ;;  %v1943_v59 = vsub.f32 %v4159_v34, %v1923_v39 }
 0x803   :  { %v2942_v33 = vpop.eup %2941  ;;  %v2132_v57 = vmul.f32 0.5, %v2116_v45  ;;  %v1942_v23 = vsub.f32 %v4162_v60, %v1921_v40 }
 0x804   :  { %v2944_v24 = vpop.eup %2943  ;;  %2165 = vst [vmem:[#allocation16 + $0x48] sm:$0xff] %v2133_v1  ;;  %v2119_v16 = vadd.f32 %v2103_v56, %v1943_v59  ;;  %v1927_v25 = vmul.f32 0.6931472, %v2942_v33 }
 0x805   :  { %2164 = vst [vmem:[#allocation16 + $0x40] sm:$0xff] %v2132_v57  ;;  %v2118_v32 = vadd.f32 %v2102_v49, %v1942_v23  ;;  %v1925_v18 = vmul.f32 0.6931472, %v2944_v24 }
 0x806   :  { %v2135_v37 = vmul.f32 0.5, %v2119_v16  ;;  %v1945_v63 = vsub.f32 %v4167_v35, %v1927_v25 }
 0x807   :  { %v2946_v34 = vpop.eup %2945  ;;  %v2134_v26 = vmul.f32 0.5, %v2118_v32  ;;  %v1944_v15 = vsub.f32 %v4170_v29, %v1925_v18 }
 0x808   :  { %v2948_v43 = vpop.eup %2947  ;;  %2167 = vst [vmem:[#allocation16 + $0x58] sm:$0xff] %v2135_v37  ;;  %v2121_v60 = vadd.f32 %v2105_v6, %v1945_v63  ;;  %v1931_v50 = vmul.f32 0.6931472, %v2946_v34 }
 0x809   :  { %2166 = vst [vmem:[#allocation16 + $0x50] sm:$0xff] %v2134_v26  ;;  %v2120_v28 = vadd.f32 %v2104_v41, %v1944_v15  ;;  %v1929_v8 = vmul.f32 0.6931472, %v2948_v43 }
 0x80a   :  { %v2137_v47 = vmul.f32 0.5, %v2121_v60  ;;  %v1947_v62 = vsub.f32 %v4175_v30, %v1931_v50 }
 0x80b   :  { %v2950_v46 = vpop.eup %2949  ;;  %v2136_v44 = vmul.f32 0.5, %v2120_v28  ;;  %v1946_v29 = vsub.f32 %v4178_v3, %v1929_v8 }
 0x80c   :  { %v2952_v17 = vpop.eup %2951  ;;  %2169 = vst [vmem:[#allocation16 + $0x68] sm:$0xff] %v2137_v47  ;;  %v2091_v48 = vmul.f32 0.6931472, %v2950_v46 }
 0x80d   :  { %2168 = vst [vmem:[#allocation16 + $0x60] sm:$0xff] %v2136_v44  ;;  %v2089_v35 = vmul.f32 0.6931472, %v2952_v17 }
 0x80e   :  { %v2107_v58 = vsub.f32 %v4183_v14, %v2091_v48 }
 0x80f   :  { %v2106_v38 = vsub.f32 %v4186_v21, %v2089_v35 }
 0x810   :  { %v2123_v53 = vadd.f32 %v2107_v58, %v1947_v62 }
 0x811   :  { %v2122_v4 = vadd.f32 %v2106_v38, %v1946_v29 }
 0x812   :  { %v2139_v52 = vmul.f32 0.5, %v2123_v53 }
 0x813   :  { %v2138_v54 = vmul.f32 0.5, %v2122_v4 }
 0x814   :  { %2171 = vst [vmem:[#allocation16 + $0x78] sm:$0xff] %v2139_v52 }
 0x815   :  { %2170 = vst [vmem:[#allocation16 + $0x70] sm:$0xff] %v2138_v54 }
 0x816   :  { %3124 = shalt.err (!%p3121_p2)
}
 0x817   :  { %2207 = dma.vmem_to_hbm [thread:$0]  %s2202_s10, 2048, %s4266_s11, [#allocation15], %s3153_s26, %s3153_s26, %s3154_s27  }
 0x818   :  { %3141 = dma.done.wait [#allocation4], 2048  }
 0x819   :  { %3142 = vsyncadd [#allocation4], 4294965248 }
 0x81a   :  { %3143 = dma.done.wait [#allocation15], 4096  }
 0x81b   :  { %3144 = vsyncadd [#allocation15], 4294963200 }
 0x81c   :  { %2217 = vsyncpa [#allocation3], 1 }
 0x81d   :  { %2218 = vsyncpa [#allocation6], 1 }
 0x81e   :  { %2219 = vsyncpa [#allocation9], 1 }
 0x81f   :  { %2220 = vsyncpa [#allocation12], 1 }
 0x820   :  { %2221 = vsyncpa [#allocation4], 1 }
 0x821   :  { %2222 = vsyncpa [#allocation15], 1 }

</bundles_post_ra>
